<compile_context>
chip_gen: v5e
topology: v5e:2x2
jax: 0.10.0
libtpu: 0.0.40
codegen_flags: <defaults>
</compile_context>

<pallas_src>
import jax
import jax.numpy as jnp
from jax import lax
from jax.experimental import pallas as pl
from jax.experimental.pallas import tpu as pltpu

# ---- static config (small synthetic shapes consistent with the module) ----
B = 2        # batch
C = 32       # channels
T = 16       # sequence length
K = 3        # conv kernel size
L = 2        # num_layers
EPS = 1e-5   # LayerNorm eps (F.layer_norm default)

BT = B * T           # rows processed in one grid step
L2 = L * 2           # total number of Blocks
KC = K * C           # packed conv-weight lanes (valid part)
KCP = 128            # lane-padded conv-weight width (unmasked vld)


def duration_predictor_kernel(x_ref, mcol_ref, mrow_ref, nf_ref, nl_ref,
                              w_ref, cb_ref, g_ref, bt_ref, ow_ref, ob_ref,
                              out_ref):
    # x_ref:    (BT, C)        all batch elements, channels-last (f32)
    # mcol_ref: (BT, 1)        sequence mask, column form
    # mrow_ref: (1, BT)        sequence mask, row form (for lane-dense output)
    # nf_ref:   (BT, 1)        0.0 where local t == 0   (left conv boundary / batch edge)
    # nl_ref:   (BT, 1)        0.0 where local t == T-1 (right conv boundary / batch edge)
    # w_ref:    (L2, C, KCP)   bf16 packed conv weights; lanes [k*C:(k+1)*C] hold W_k
    # cb_ref:   (L2, 1, C)     conv biases
    # g_ref:    (L2, 1, C)     LayerNorm gamma
    # bt_ref:   (L2, 1, C)     LayerNorm beta
    # ow_ref:   (1, C)         out_layer 1x1 conv weight (row)
    # ob_ref:   (1, 1)         out_layer bias
    # out_ref:  (1, BT)        lane-dense output row
    x = x_ref[...]                  # (BT, C) f32
    mcol = mcol_ref[...]            # (BT, 1)
    not_first = nf_ref[...]         # (BT, 1)
    not_last = nl_ref[...]          # (BT, 1)

    for l in range(L):
        y = x
        for s in range(2):          # the two Blocks of a Layer
            i = l * 2 + s
            # ---- Conv1d(C, C, K=3, padding=1) as ONE bf16 MXU matmul ----
            #   Y[:, k*C:(k+1)*C] = y @ W_k ;  conv[t] = sum_k Y[t + k - 1, group k]
            Y = jnp.dot(y.astype(jnp.bfloat16), w_ref[i],
                        preferred_element_type=jnp.float32)       # (BT, KCP) f32
            y0 = Y[:, 0:C]          # tap k=0 -> needs row t-1
            y1 = Y[:, C:2 * C]      # tap k=1 -> row t
            y2 = Y[:, 2 * C:3 * C]  # tap k=2 -> needs row t+1
            conv = (y1
                    + jnp.roll(y0, 1, axis=0) * not_first         # zero-pad left edge
                    + jnp.roll(y2, -1, axis=0) * not_last)        # zero-pad right edge
            y = conv + cb_ref[i]                                  # (BT, C) + (1, C)
            # ---- LayerNorm over channels (f32) ----
            mean = jnp.mean(y, axis=-1, keepdims=True)
            var = jnp.mean((y - mean) ** 2, axis=-1, keepdims=True)
            y = (y - mean) * lax.rsqrt(var + EPS) * g_ref[i] + bt_ref[i]
            # ---- exact GELU + sequence mask (dropout = identity in eval) ----
            y = 0.5 * y * (1.0 + lax.erf(y * 0.7071067811865476))
            y = y * mcol
        x = x + y               # residual around each Layer

    # ---- out_layer: Conv1d(C, 1, 1) -> lane-dense (1, BT) row, then mask ----
    proj = lax.dot_general(ow_ref[...], x, (((1,), (1,)), ((), ())),
                           preferred_element_type=jnp.float32)    # (1, BT)
    out_ref[...] = (proj + ob_ref[...]) * mrow_ref[...]


@jax.jit
def duration_predictor(x_btc, mask_bt1, cw, cb, g, bt, ow, ob):
    # ---- wrapper-side repacking into lane-dense, kernel-friendly slabs ----
    x_flat = x_btc.reshape(BT, C)
    mcol = mask_bt1.reshape(BT, 1)
    mrow = mask_bt1.reshape(1, BT)

    t_idx = jnp.arange(BT, dtype=jnp.int32) % T
    nf = (t_idx != 0).astype(jnp.float32).reshape(BT, 1)
    nl = (t_idx != T - 1).astype(jnp.float32).reshape(BT, 1)

    # conv weights (L,2,K,C,C)[l,s,k,cin,cout] -> (L2, C, K*C) -> pad lanes to 128, bf16
    wp = jnp.transpose(cw.reshape(L2, K, C, C), (0, 2, 1, 3)).reshape(L2, C, KC)
    wp = jnp.pad(wp, ((0, 0), (0, 0), (0, KCP - KC))).astype(jnp.bfloat16)

    cb2 = cb.reshape(L2, 1, C)
    g2 = g.reshape(L2, 1, C)
    bt2 = bt.reshape(L2, 1, C)
    ow_row = ow.reshape(1, C)
    ob2 = ob.reshape(1, 1)

    out_row = pl.pallas_call(
        duration_predictor_kernel,
        out_shape=jax.ShapeDtypeStruct((1, BT), jnp.float32),
        grid_spec=pltpu.PrefetchScalarGridSpec(
            num_scalar_prefetch=0,
            grid=(1,),                                   # single step: all data resident
            in_specs=[
                pl.BlockSpec((BT, C), lambda i: (0, 0)),
                pl.BlockSpec((BT, 1), lambda i: (0, 0)),
                pl.BlockSpec((1, BT), lambda i: (0, 0)),
                pl.BlockSpec((BT, 1), lambda i: (0, 0)),
                pl.BlockSpec((BT, 1), lambda i: (0, 0)),
                pl.BlockSpec((L2, C, KCP), lambda i: (0, 0, 0)),
                pl.BlockSpec((L2, 1, C), lambda i: (0, 0, 0)),
                pl.BlockSpec((L2, 1, C), lambda i: (0, 0, 0)),
                pl.BlockSpec((L2, 1, C), lambda i: (0, 0, 0)),
                pl.BlockSpec((1, C), lambda i: (0, 0)),
                pl.BlockSpec((1, 1), lambda i: (0, 0)),
            ],
            out_specs=pl.BlockSpec((1, BT), lambda i: (0, 0)),
        ),
        compiler_params=pltpu.CompilerParams(
            dimension_semantics=("arbitrary",)),
    )(x_flat, mcol, mrow, nf, nl, wp, cb2, g2, bt2, ow_row, ob2)

    return out_row.reshape(B, T, 1)


# ------------------- pure-JAX reference (channels-last, bf16 MXU operands) -------------------
def reference(x, mask, cw, cb, g, bt, ow, ob):
    pad = K // 2

    def conv(xx, wk, b):
        xp = jnp.pad(xx, ((0, 0), (pad, pad), (0, 0)))
        y = sum(jnp.einsum('btc,cd->btd',
                           xp[:, k:k + T, :].astype(jnp.bfloat16),
                           wk[k].astype(jnp.bfloat16),
                           preferred_element_type=jnp.float32)
                for k in range(K))
        return y + b

    def block(xx, l, s):
        y = conv(xx, cw[l, s], cb[l, s])
        mean = jnp.mean(y, axis=-1, keepdims=True)
        var = jnp.mean((y - mean) ** 2, axis=-1, keepdims=True)
        y = (y - mean) * lax.rsqrt(var + EPS) * g[l, s] + bt[l, s]
        y = 0.5 * y * (1.0 + lax.erf(y * 0.7071067811865476))
        return y * mask

    for l in range(L):
        y = block(x, l, 0)
        y = block(y, l, 1)
        x = x + y
    out = jnp.einsum('btc,co->bto', x, ow,
                     preferred_element_type=jnp.float32) + ob
    return out * mask


if __name__ == "__main__":
    key = jax.random.PRNGKey(0)
    ks = jax.random.split(key, 8)

    # deterministic synthetic parameters (shapes follow DurationPredictor.__init__)
    cw = 0.1 * jax.random.normal(ks[0], (L, 2, K, C, C), jnp.float32)    # conv weights (k, c_in, c_out)
    cb = 0.05 * jax.random.normal(ks[1], (L, 2, 1, C), jnp.float32)      # conv biases
    g = 1.0 + 0.1 * jax.random.normal(ks[2], (L, 2, 1, C), jnp.float32)  # LayerNorm gamma
    bt = 0.1 * jax.random.normal(ks[3], (L, 2, 1, C), jnp.float32)       # LayerNorm beta
    ow = 0.1 * jax.random.normal(ks[4], (C, 1), jnp.float32)             # out_layer weight
    ob = 0.05 * jax.random.normal(ks[5], (1, 1), jnp.float32)            # out_layer bias

    # inputs: PyTorch side would be x:(B, C, T), mask:(B, 1, T); kernel uses (B, T, C)/(B, T, 1)
    x_btc = jax.random.normal(ks[6], (B, T, C), jnp.float32)
    lengths = jnp.array([T, T - 4], dtype=jnp.int32)
    mask_bt1 = (jnp.arange(T)[None, :] < lengths[:, None]).astype(jnp.float32)[..., None]

    out = duration_predictor(x_btc, mask_bt1, cw, cb, g, bt, ow, ob)
    out = jax.block_until_ready(out)

    ref = reference(x_btc, mask_bt1, cw, cb, g, bt, ow, ob)
    assert out.shape == (B, T, 1)
    assert jnp.allclose(out, ref, atol=1e-3, rtol=1e-3), "mismatch vs pure-JAX reference"

    print("KERNEL_OK")
</pallas_src>

<mosaic_0001>
module attributes {stable_mosaic.version = 11 : i64} {
  func.func @duration_predictor_kernel(%arg0: i32, %arg1: memref<32x32xf32, #tpu.memory_space<vmem>>, %arg2: memref<32x1xf32, #tpu.memory_space<vmem>>, %arg3: memref<1x32xf32, #tpu.memory_space<vmem>>, %arg4: memref<32x1xf32, #tpu.memory_space<vmem>>, %arg5: memref<32x1xf32, #tpu.memory_space<vmem>>, %arg6: memref<4x32x128xbf16, #tpu.memory_space<vmem>>, %arg7: memref<4x1x32xf32, #tpu.memory_space<vmem>>, %arg8: memref<4x1x32xf32, #tpu.memory_space<vmem>>, %arg9: memref<4x1x32xf32, #tpu.memory_space<vmem>>, %arg10: memref<1x32xf32, #tpu.memory_space<vmem>>, %arg11: memref<1x1xf32, #tpu.memory_space<vmem>>, %arg12: memref<1x32xf32, #tpu.memory_space<vmem>>) attributes {dimension_semantics = [#tpu.dimension_semantics<arbitrary>], iteration_bounds = array<i64: 1>, scalar_prefetch = 0 : i64, scratch_operands = 0 : i64, tpu.core_type = #tpu.core_type<tc>, window_params = [{pipeline_mode = #tpu.pipeline_mode<synchronous>, transform_indices = @transform_0, window_bounds = array<i64: 32, 32>}, {pipeline_mode = #tpu.pipeline_mode<synchronous>, transform_indices = @transform_1, window_bounds = array<i64: 32, 1>}, {pipeline_mode = #tpu.pipeline_mode<synchronous>, transform_indices = @transform_2, window_bounds = array<i64: 1, 32>}, {pipeline_mode = #tpu.pipeline_mode<synchronous>, transform_indices = @transform_3, window_bounds = array<i64: 32, 1>}, {pipeline_mode = #tpu.pipeline_mode<synchronous>, transform_indices = @transform_4, window_bounds = array<i64: 32, 1>}, {pipeline_mode = #tpu.pipeline_mode<synchronous>, transform_indices = @transform_5, window_bounds = array<i64: 4, 32, 128>}, {pipeline_mode = #tpu.pipeline_mode<synchronous>, transform_indices = @transform_6, window_bounds = array<i64: 4, 1, 32>}, {pipeline_mode = #tpu.pipeline_mode<synchronous>, transform_indices = @transform_7, window_bounds = array<i64: 4, 1, 32>}, {pipeline_mode = #tpu.pipeline_mode<synchronous>, transform_indices = @transform_8, window_bounds = array<i64: 4, 1, 32>}, {pipeline_mode = #tpu.pipeline_mode<synchronous>, transform_indices = @transform_9, window_bounds = array<i64: 1, 32>}, {pipeline_mode = #tpu.pipeline_mode<synchronous>, transform_indices = @transform_10, window_bounds = array<i64: 1, 1>}, {pipeline_mode = #tpu.pipeline_mode<synchronous>, transform_indices = @transform_11, window_bounds = array<i64: 1, 32>}]} {
    %c0 = arith.constant 0 : index
    %c0_0 = arith.constant 0 : index
    %0 = vector.load %arg1[%c0, %c0_0] : memref<32x32xf32, #tpu.memory_space<vmem>>, vector<32x32xf32>
    %c0_1 = arith.constant 0 : index
    %c0_2 = arith.constant 0 : index
    %1 = vector.load %arg2[%c0_1, %c0_2] : memref<32x1xf32, #tpu.memory_space<vmem>>, vector<32x1xf32>
    %c0_3 = arith.constant 0 : index
    %c0_4 = arith.constant 0 : index
    %2 = vector.load %arg4[%c0_3, %c0_4] : memref<32x1xf32, #tpu.memory_space<vmem>>, vector<32x1xf32>
    %c0_5 = arith.constant 0 : index
    %c0_6 = arith.constant 0 : index
    %3 = vector.load %arg5[%c0_5, %c0_6] : memref<32x1xf32, #tpu.memory_space<vmem>>, vector<32x1xf32>
    %4 = arith.truncf %0 : vector<32x32xf32> to vector<32x32xbf16>
    %c0_7 = arith.constant 0 : index
    %c0_8 = arith.constant 0 : index
    %c0_9 = arith.constant 0 : index
    %5 = vector.load %arg6[%c0_7, %c0_8, %c0_9] : memref<4x32x128xbf16, #tpu.memory_space<vmem>>, vector<1x32x128xbf16>
    %6 = vector.shape_cast %5 : vector<1x32x128xbf16> to vector<32x128xbf16>
    %cst = arith.constant dense<0.000000e+00> : vector<32x128xf32>
    %7 = tpu.matmul %4, %6, %cst {dimension_numbers = #tpu.dot_dimension_numbers<[1], [0], [0], [1], [0, 0, 1, 1], [], []>} : vector<32x32xbf16>, vector<32x128xbf16>, vector<32x128xf32> -> vector<32x128xf32>
    %8 = vector.extract_strided_slice %7 {offsets = [0, 0], sizes = [32, 32], strides = [1, 1]} : vector<32x128xf32> to vector<32x32xf32>
    %9 = vector.extract_strided_slice %7 {offsets = [0, 32], sizes = [32, 32], strides = [1, 1]} : vector<32x128xf32> to vector<32x32xf32>
    %10 = vector.extract_strided_slice %7 {offsets = [0, 64], sizes = [32, 32], strides = [1, 1]} : vector<32x128xf32> to vector<32x32xf32>
    %11 = vector.extract_strided_slice %8 {offsets = [31, 0], sizes = [1, 32], strides = [1, 1]} : vector<32x32xf32> to vector<1x32xf32>
    %12 = vector.extract_strided_slice %8 {offsets = [0, 0], sizes = [31, 32], strides = [1, 1]} : vector<32x32xf32> to vector<31x32xf32>
    %13 = tpu.concatenate %11, %12 in 0 : vector<1x32xf32>, vector<31x32xf32> -> vector<32x32xf32>
    %14 = vector.broadcast %2 : vector<32x1xf32> to vector<32x32xf32>
    %15 = arith.mulf %13, %14 : vector<32x32xf32>
    %16 = arith.addf %9, %15 : vector<32x32xf32>
    %17 = vector.extract_strided_slice %10 {offsets = [1, 0], sizes = [31, 32], strides = [1, 1]} : vector<32x32xf32> to vector<31x32xf32>
    %18 = vector.extract_strided_slice %10 {offsets = [0, 0], sizes = [1, 32], strides = [1, 1]} : vector<32x32xf32> to vector<1x32xf32>
    %19 = tpu.concatenate %17, %18 in 0 : vector<31x32xf32>, vector<1x32xf32> -> vector<32x32xf32>
    %20 = vector.broadcast %3 : vector<32x1xf32> to vector<32x32xf32>
    %21 = arith.mulf %19, %20 : vector<32x32xf32>
    %22 = arith.addf %16, %21 : vector<32x32xf32>
    %c0_10 = arith.constant 0 : index
    %c0_11 = arith.constant 0 : index
    %c0_12 = arith.constant 0 : index
    %23 = vector.load %arg7[%c0_10, %c0_11, %c0_12] : memref<4x1x32xf32, #tpu.memory_space<vmem>>, vector<1x1x32xf32>
    %24 = vector.shape_cast %23 : vector<1x1x32xf32> to vector<1x32xf32>
    %25 = vector.broadcast %24 : vector<1x32xf32> to vector<32x32xf32>
    %26 = arith.addf %22, %25 : vector<32x32xf32>
    %cst_13 = arith.constant dense<0.000000e+00> : vector<32xf32>
    %27 = vector.multi_reduction <add>, %26, %cst_13 [1] : vector<32x32xf32> to vector<32xf32>
    %28 = vector.shape_cast %27 : vector<32xf32> to vector<32x1xf32>
    %cst_14 = arith.constant 3.200000e+01 : f32
    %29 = vector.broadcast %cst_14 : f32 to vector<32x1xf32>
    %30 = arith.divf %28, %29 : vector<32x1xf32>
    %31 = vector.broadcast %30 : vector<32x1xf32> to vector<32x32xf32>
    %32 = arith.subf %26, %31 : vector<32x32xf32>
    %33 = arith.mulf %32, %32 : vector<32x32xf32>
    %cst_15 = arith.constant dense<0.000000e+00> : vector<32xf32>
    %34 = vector.multi_reduction <add>, %33, %cst_15 [1] : vector<32x32xf32> to vector<32xf32>
    %35 = vector.shape_cast %34 : vector<32xf32> to vector<32x1xf32>
    %cst_16 = arith.constant 3.200000e+01 : f32
    %36 = vector.broadcast %cst_16 : f32 to vector<32x1xf32>
    %37 = arith.divf %35, %36 : vector<32x1xf32>
    %38 = vector.broadcast %30 : vector<32x1xf32> to vector<32x32xf32>
    %39 = arith.subf %26, %38 : vector<32x32xf32>
    %cst_17 = arith.constant 9.99999974E-6 : f32
    %40 = vector.broadcast %cst_17 : f32 to vector<32x1xf32>
    %41 = arith.addf %37, %40 : vector<32x1xf32>
    %42 = math.rsqrt %41 : vector<32x1xf32>
    %43 = vector.broadcast %42 : vector<32x1xf32> to vector<32x32xf32>
    %44 = arith.mulf %39, %43 : vector<32x32xf32>
    %c0_18 = arith.constant 0 : index
    %c0_19 = arith.constant 0 : index
    %c0_20 = arith.constant 0 : index
    %45 = vector.load %arg8[%c0_18, %c0_19, %c0_20] : memref<4x1x32xf32, #tpu.memory_space<vmem>>, vector<1x1x32xf32>
    %46 = vector.shape_cast %45 : vector<1x1x32xf32> to vector<1x32xf32>
    %47 = vector.broadcast %46 : vector<1x32xf32> to vector<32x32xf32>
    %48 = arith.mulf %44, %47 : vector<32x32xf32>
    %c0_21 = arith.constant 0 : index
    %c0_22 = arith.constant 0 : index
    %c0_23 = arith.constant 0 : index
    %49 = vector.load %arg9[%c0_21, %c0_22, %c0_23] : memref<4x1x32xf32, #tpu.memory_space<vmem>>, vector<1x1x32xf32>
    %50 = vector.shape_cast %49 : vector<1x1x32xf32> to vector<1x32xf32>
    %51 = vector.broadcast %50 : vector<1x32xf32> to vector<32x32xf32>
    %52 = arith.addf %48, %51 : vector<32x32xf32>
    %cst_24 = arith.constant 5.000000e-01 : f32
    %53 = vector.broadcast %cst_24 : f32 to vector<32x32xf32>
    %54 = arith.mulf %53, %52 : vector<32x32xf32>
    %cst_25 = arith.constant 0.707106769 : f32
    %55 = vector.broadcast %cst_25 : f32 to vector<32x32xf32>
    %56 = arith.mulf %52, %55 : vector<32x32xf32>
    %57 = math.erf %56 : vector<32x32xf32>
    %cst_26 = arith.constant 1.000000e+00 : f32
    %58 = vector.broadcast %cst_26 : f32 to vector<32x32xf32>
    %59 = arith.addf %58, %57 : vector<32x32xf32>
    %60 = arith.mulf %54, %59 : vector<32x32xf32>
    %61 = vector.broadcast %1 : vector<32x1xf32> to vector<32x32xf32>
    %62 = arith.mulf %60, %61 : vector<32x32xf32>
    %63 = arith.truncf %62 : vector<32x32xf32> to vector<32x32xbf16>
    %c1 = arith.constant 1 : index
    %c0_27 = arith.constant 0 : index
    %c0_28 = arith.constant 0 : index
    %64 = vector.load %arg6[%c1, %c0_27, %c0_28] : memref<4x32x128xbf16, #tpu.memory_space<vmem>>, vector<1x32x128xbf16>
    %65 = vector.shape_cast %64 : vector<1x32x128xbf16> to vector<32x128xbf16>
    %cst_29 = arith.constant dense<0.000000e+00> : vector<32x128xf32>
    %66 = tpu.matmul %63, %65, %cst_29 {dimension_numbers = #tpu.dot_dimension_numbers<[1], [0], [0], [1], [0, 0, 1, 1], [], []>} : vector<32x32xbf16>, vector<32x128xbf16>, vector<32x128xf32> -> vector<32x128xf32>
    %67 = vector.extract_strided_slice %66 {offsets = [0, 0], sizes = [32, 32], strides = [1, 1]} : vector<32x128xf32> to vector<32x32xf32>
    %68 = vector.extract_strided_slice %66 {offsets = [0, 32], sizes = [32, 32], strides = [1, 1]} : vector<32x128xf32> to vector<32x32xf32>
    %69 = vector.extract_strided_slice %66 {offsets = [0, 64], sizes = [32, 32], strides = [1, 1]} : vector<32x128xf32> to vector<32x32xf32>
    %70 = vector.extract_strided_slice %67 {offsets = [31, 0], sizes = [1, 32], strides = [1, 1]} : vector<32x32xf32> to vector<1x32xf32>
    %71 = vector.extract_strided_slice %67 {offsets = [0, 0], sizes = [31, 32], strides = [1, 1]} : vector<32x32xf32> to vector<31x32xf32>
    %72 = tpu.concatenate %70, %71 in 0 : vector<1x32xf32>, vector<31x32xf32> -> vector<32x32xf32>
    %73 = vector.broadcast %2 : vector<32x1xf32> to vector<32x32xf32>
    %74 = arith.mulf %72, %73 : vector<32x32xf32>
    %75 = arith.addf %68, %74 : vector<32x32xf32>
    %76 = vector.extract_strided_slice %69 {offsets = [1, 0], sizes = [31, 32], strides = [1, 1]} : vector<32x32xf32> to vector<31x32xf32>
    %77 = vector.extract_strided_slice %69 {offsets = [0, 0], sizes = [1, 32], strides = [1, 1]} : vector<32x32xf32> to vector<1x32xf32>
    %78 = tpu.concatenate %76, %77 in 0 : vector<31x32xf32>, vector<1x32xf32> -> vector<32x32xf32>
    %79 = vector.broadcast %3 : vector<32x1xf32> to vector<32x32xf32>
    %80 = arith.mulf %78, %79 : vector<32x32xf32>
    %81 = arith.addf %75, %80 : vector<32x32xf32>
    %c1_30 = arith.constant 1 : index
    %c0_31 = arith.constant 0 : index
    %c0_32 = arith.constant 0 : index
    %82 = vector.load %arg7[%c1_30, %c0_31, %c0_32] : memref<4x1x32xf32, #tpu.memory_space<vmem>>, vector<1x1x32xf32>
    %83 = vector.shape_cast %82 : vector<1x1x32xf32> to vector<1x32xf32>
    %84 = vector.broadcast %83 : vector<1x32xf32> to vector<32x32xf32>
    %85 = arith.addf %81, %84 : vector<32x32xf32>
    %cst_33 = arith.constant dense<0.000000e+00> : vector<32xf32>
    %86 = vector.multi_reduction <add>, %85, %cst_33 [1] : vector<32x32xf32> to vector<32xf32>
    %87 = vector.shape_cast %86 : vector<32xf32> to vector<32x1xf32>
    %cst_34 = arith.constant 3.200000e+01 : f32
    %88 = vector.broadcast %cst_34 : f32 to vector<32x1xf32>
    %89 = arith.divf %87, %88 : vector<32x1xf32>
    %90 = vector.broadcast %89 : vector<32x1xf32> to vector<32x32xf32>
    %91 = arith.subf %85, %90 : vector<32x32xf32>
    %92 = arith.mulf %91, %91 : vector<32x32xf32>
    %cst_35 = arith.constant dense<0.000000e+00> : vector<32xf32>
    %93 = vector.multi_reduction <add>, %92, %cst_35 [1] : vector<32x32xf32> to vector<32xf32>
    %94 = vector.shape_cast %93 : vector<32xf32> to vector<32x1xf32>
    %cst_36 = arith.constant 3.200000e+01 : f32
    %95 = vector.broadcast %cst_36 : f32 to vector<32x1xf32>
    %96 = arith.divf %94, %95 : vector<32x1xf32>
    %97 = vector.broadcast %89 : vector<32x1xf32> to vector<32x32xf32>
    %98 = arith.subf %85, %97 : vector<32x32xf32>
    %cst_37 = arith.constant 9.99999974E-6 : f32
    %99 = vector.broadcast %cst_37 : f32 to vector<32x1xf32>
    %100 = arith.addf %96, %99 : vector<32x1xf32>
    %101 = math.rsqrt %100 : vector<32x1xf32>
    %102 = vector.broadcast %101 : vector<32x1xf32> to vector<32x32xf32>
    %103 = arith.mulf %98, %102 : vector<32x32xf32>
    %c1_38 = arith.constant 1 : index
    %c0_39 = arith.constant 0 : index
    %c0_40 = arith.constant 0 : index
    %104 = vector.load %arg8[%c1_38, %c0_39, %c0_40] : memref<4x1x32xf32, #tpu.memory_space<vmem>>, vector<1x1x32xf32>
    %105 = vector.shape_cast %104 : vector<1x1x32xf32> to vector<1x32xf32>
    %106 = vector.broadcast %105 : vector<1x32xf32> to vector<32x32xf32>
    %107 = arith.mulf %103, %106 : vector<32x32xf32>
    %c1_41 = arith.constant 1 : index
    %c0_42 = arith.constant 0 : index
    %c0_43 = arith.constant 0 : index
    %108 = vector.load %arg9[%c1_41, %c0_42, %c0_43] : memref<4x1x32xf32, #tpu.memory_space<vmem>>, vector<1x1x32xf32>
    %109 = vector.shape_cast %108 : vector<1x1x32xf32> to vector<1x32xf32>
    %110 = vector.broadcast %109 : vector<1x32xf32> to vector<32x32xf32>
    %111 = arith.addf %107, %110 : vector<32x32xf32>
    %cst_44 = arith.constant 5.000000e-01 : f32
    %112 = vector.broadcast %cst_44 : f32 to vector<32x32xf32>
    %113 = arith.mulf %112, %111 : vector<32x32xf32>
    %cst_45 = arith.constant 0.707106769 : f32
    %114 = vector.broadcast %cst_45 : f32 to vector<32x32xf32>
    %115 = arith.mulf %111, %114 : vector<32x32xf32>
    %116 = math.erf %115 : vector<32x32xf32>
    %cst_46 = arith.constant 1.000000e+00 : f32
    %117 = vector.broadcast %cst_46 : f32 to vector<32x32xf32>
    %118 = arith.addf %117, %116 : vector<32x32xf32>
    %119 = arith.mulf %113, %118 : vector<32x32xf32>
    %120 = vector.broadcast %1 : vector<32x1xf32> to vector<32x32xf32>
    %121 = arith.mulf %119, %120 : vector<32x32xf32>
    %122 = arith.addf %0, %121 : vector<32x32xf32>
    %123 = arith.truncf %122 : vector<32x32xf32> to vector<32x32xbf16>
    %c2 = arith.constant 2 : index
    %c0_47 = arith.constant 0 : index
    %c0_48 = arith.constant 0 : index
    %124 = vector.load %arg6[%c2, %c0_47, %c0_48] : memref<4x32x128xbf16, #tpu.memory_space<vmem>>, vector<1x32x128xbf16>
    %125 = vector.shape_cast %124 : vector<1x32x128xbf16> to vector<32x128xbf16>
    %cst_49 = arith.constant dense<0.000000e+00> : vector<32x128xf32>
    %126 = tpu.matmul %123, %125, %cst_49 {dimension_numbers = #tpu.dot_dimension_numbers<[1], [0], [0], [1], [0, 0, 1, 1], [], []>} : vector<32x32xbf16>, vector<32x128xbf16>, vector<32x128xf32> -> vector<32x128xf32>
    %127 = vector.extract_strided_slice %126 {offsets = [0, 0], sizes = [32, 32], strides = [1, 1]} : vector<32x128xf32> to vector<32x32xf32>
    %128 = vector.extract_strided_slice %126 {offsets = [0, 32], sizes = [32, 32], strides = [1, 1]} : vector<32x128xf32> to vector<32x32xf32>
    %129 = vector.extract_strided_slice %126 {offsets = [0, 64], sizes = [32, 32], strides = [1, 1]} : vector<32x128xf32> to vector<32x32xf32>
    %130 = vector.extract_strided_slice %127 {offsets = [31, 0], sizes = [1, 32], strides = [1, 1]} : vector<32x32xf32> to vector<1x32xf32>
    %131 = vector.extract_strided_slice %127 {offsets = [0, 0], sizes = [31, 32], strides = [1, 1]} : vector<32x32xf32> to vector<31x32xf32>
    %132 = tpu.concatenate %130, %131 in 0 : vector<1x32xf32>, vector<31x32xf32> -> vector<32x32xf32>
    %133 = vector.broadcast %2 : vector<32x1xf32> to vector<32x32xf32>
    %134 = arith.mulf %132, %133 : vector<32x32xf32>
    %135 = arith.addf %128, %134 : vector<32x32xf32>
    %136 = vector.extract_strided_slice %129 {offsets = [1, 0], sizes = [31, 32], strides = [1, 1]} : vector<32x32xf32> to vector<31x32xf32>
    %137 = vector.extract_strided_slice %129 {offsets = [0, 0], sizes = [1, 32], strides = [1, 1]} : vector<32x32xf32> to vector<1x32xf32>
    %138 = tpu.concatenate %136, %137 in 0 : vector<31x32xf32>, vector<1x32xf32> -> vector<32x32xf32>
    %139 = vector.broadcast %3 : vector<32x1xf32> to vector<32x32xf32>
    %140 = arith.mulf %138, %139 : vector<32x32xf32>
    %141 = arith.addf %135, %140 : vector<32x32xf32>
    %c2_50 = arith.constant 2 : index
    %c0_51 = arith.constant 0 : index
    %c0_52 = arith.constant 0 : index
    %142 = vector.load %arg7[%c2_50, %c0_51, %c0_52] : memref<4x1x32xf32, #tpu.memory_space<vmem>>, vector<1x1x32xf32>
    %143 = vector.shape_cast %142 : vector<1x1x32xf32> to vector<1x32xf32>
    %144 = vector.broadcast %143 : vector<1x32xf32> to vector<32x32xf32>
    %145 = arith.addf %141, %144 : vector<32x32xf32>
    %cst_53 = arith.constant dense<0.000000e+00> : vector<32xf32>
    %146 = vector.multi_reduction <add>, %145, %cst_53 [1] : vector<32x32xf32> to vector<32xf32>
    %147 = vector.shape_cast %146 : vector<32xf32> to vector<32x1xf32>
    %cst_54 = arith.constant 3.200000e+01 : f32
    %148 = vector.broadcast %cst_54 : f32 to vector<32x1xf32>
    %149 = arith.divf %147, %148 : vector<32x1xf32>
    %150 = vector.broadcast %149 : vector<32x1xf32> to vector<32x32xf32>
    %151 = arith.subf %145, %150 : vector<32x32xf32>
    %152 = arith.mulf %151, %151 : vector<32x32xf32>
    %cst_55 = arith.constant dense<0.000000e+00> : vector<32xf32>
    %153 = vector.multi_reduction <add>, %152, %cst_55 [1] : vector<32x32xf32> to vector<32xf32>
    %154 = vector.shape_cast %153 : vector<32xf32> to vector<32x1xf32>
    %cst_56 = arith.constant 3.200000e+01 : f32
    %155 = vector.broadcast %cst_56 : f32 to vector<32x1xf32>
    %156 = arith.divf %154, %155 : vector<32x1xf32>
    %157 = vector.broadcast %149 : vector<32x1xf32> to vector<32x32xf32>
    %158 = arith.subf %145, %157 : vector<32x32xf32>
    %cst_57 = arith.constant 9.99999974E-6 : f32
    %159 = vector.broadcast %cst_57 : f32 to vector<32x1xf32>
    %160 = arith.addf %156, %159 : vector<32x1xf32>
    %161 = math.rsqrt %160 : vector<32x1xf32>
    %162 = vector.broadcast %161 : vector<32x1xf32> to vector<32x32xf32>
    %163 = arith.mulf %158, %162 : vector<32x32xf32>
    %c2_58 = arith.constant 2 : index
    %c0_59 = arith.constant 0 : index
    %c0_60 = arith.constant 0 : index
    %164 = vector.load %arg8[%c2_58, %c0_59, %c0_60] : memref<4x1x32xf32, #tpu.memory_space<vmem>>, vector<1x1x32xf32>
    %165 = vector.shape_cast %164 : vector<1x1x32xf32> to vector<1x32xf32>
    %166 = vector.broadcast %165 : vector<1x32xf32> to vector<32x32xf32>
    %167 = arith.mulf %163, %166 : vector<32x32xf32>
    %c2_61 = arith.constant 2 : index
    %c0_62 = arith.constant 0 : index
    %c0_63 = arith.constant 0 : index
    %168 = vector.load %arg9[%c2_61, %c0_62, %c0_63] : memref<4x1x32xf32, #tpu.memory_space<vmem>>, vector<1x1x32xf32>
    %169 = vector.shape_cast %168 : vector<1x1x32xf32> to vector<1x32xf32>
    %170 = vector.broadcast %169 : vector<1x32xf32> to vector<32x32xf32>
    %171 = arith.addf %167, %170 : vector<32x32xf32>
    %cst_64 = arith.constant 5.000000e-01 : f32
    %172 = vector.broadcast %cst_64 : f32 to vector<32x32xf32>
    %173 = arith.mulf %172, %171 : vector<32x32xf32>
    %cst_65 = arith.constant 0.707106769 : f32
    %174 = vector.broadcast %cst_65 : f32 to vector<32x32xf32>
    %175 = arith.mulf %171, %174 : vector<32x32xf32>
    %176 = math.erf %175 : vector<32x32xf32>
    %cst_66 = arith.constant 1.000000e+00 : f32
    %177 = vector.broadcast %cst_66 : f32 to vector<32x32xf32>
    %178 = arith.addf %177, %176 : vector<32x32xf32>
    %179 = arith.mulf %173, %178 : vector<32x32xf32>
    %180 = vector.broadcast %1 : vector<32x1xf32> to vector<32x32xf32>
    %181 = arith.mulf %179, %180 : vector<32x32xf32>
    %182 = arith.truncf %181 : vector<32x32xf32> to vector<32x32xbf16>
    %c3 = arith.constant 3 : index
    %c0_67 = arith.constant 0 : index
    %c0_68 = arith.constant 0 : index
    %183 = vector.load %arg6[%c3, %c0_67, %c0_68] : memref<4x32x128xbf16, #tpu.memory_space<vmem>>, vector<1x32x128xbf16>
    %184 = vector.shape_cast %183 : vector<1x32x128xbf16> to vector<32x128xbf16>
    %cst_69 = arith.constant dense<0.000000e+00> : vector<32x128xf32>
    %185 = tpu.matmul %182, %184, %cst_69 {dimension_numbers = #tpu.dot_dimension_numbers<[1], [0], [0], [1], [0, 0, 1, 1], [], []>} : vector<32x32xbf16>, vector<32x128xbf16>, vector<32x128xf32> -> vector<32x128xf32>
    %186 = vector.extract_strided_slice %185 {offsets = [0, 0], sizes = [32, 32], strides = [1, 1]} : vector<32x128xf32> to vector<32x32xf32>
    %187 = vector.extract_strided_slice %185 {offsets = [0, 32], sizes = [32, 32], strides = [1, 1]} : vector<32x128xf32> to vector<32x32xf32>
    %188 = vector.extract_strided_slice %185 {offsets = [0, 64], sizes = [32, 32], strides = [1, 1]} : vector<32x128xf32> to vector<32x32xf32>
    %189 = vector.extract_strided_slice %186 {offsets = [31, 0], sizes = [1, 32], strides = [1, 1]} : vector<32x32xf32> to vector<1x32xf32>
    %190 = vector.extract_strided_slice %186 {offsets = [0, 0], sizes = [31, 32], strides = [1, 1]} : vector<32x32xf32> to vector<31x32xf32>
    %191 = tpu.concatenate %189, %190 in 0 : vector<1x32xf32>, vector<31x32xf32> -> vector<32x32xf32>
    %192 = vector.broadcast %2 : vector<32x1xf32> to vector<32x32xf32>
    %193 = arith.mulf %191, %192 : vector<32x32xf32>
    %194 = arith.addf %187, %193 : vector<32x32xf32>
    %195 = vector.extract_strided_slice %188 {offsets = [1, 0], sizes = [31, 32], strides = [1, 1]} : vector<32x32xf32> to vector<31x32xf32>
    %196 = vector.extract_strided_slice %188 {offsets = [0, 0], sizes = [1, 32], strides = [1, 1]} : vector<32x32xf32> to vector<1x32xf32>
    %197 = tpu.concatenate %195, %196 in 0 : vector<31x32xf32>, vector<1x32xf32> -> vector<32x32xf32>
    %198 = vector.broadcast %3 : vector<32x1xf32> to vector<32x32xf32>
    %199 = arith.mulf %197, %198 : vector<32x32xf32>
    %200 = arith.addf %194, %199 : vector<32x32xf32>
    %c3_70 = arith.constant 3 : index
    %c0_71 = arith.constant 0 : index
    %c0_72 = arith.constant 0 : index
    %201 = vector.load %arg7[%c3_70, %c0_71, %c0_72] : memref<4x1x32xf32, #tpu.memory_space<vmem>>, vector<1x1x32xf32>
    %202 = vector.shape_cast %201 : vector<1x1x32xf32> to vector<1x32xf32>
    %203 = vector.broadcast %202 : vector<1x32xf32> to vector<32x32xf32>
    %204 = arith.addf %200, %203 : vector<32x32xf32>
    %cst_73 = arith.constant dense<0.000000e+00> : vector<32xf32>
    %205 = vector.multi_reduction <add>, %204, %cst_73 [1] : vector<32x32xf32> to vector<32xf32>
    %206 = vector.shape_cast %205 : vector<32xf32> to vector<32x1xf32>
    %cst_74 = arith.constant 3.200000e+01 : f32
    %207 = vector.broadcast %cst_74 : f32 to vector<32x1xf32>
    %208 = arith.divf %206, %207 : vector<32x1xf32>
    %209 = vector.broadcast %208 : vector<32x1xf32> to vector<32x32xf32>
    %210 = arith.subf %204, %209 : vector<32x32xf32>
    %211 = arith.mulf %210, %210 : vector<32x32xf32>
    %cst_75 = arith.constant dense<0.000000e+00> : vector<32xf32>
    %212 = vector.multi_reduction <add>, %211, %cst_75 [1] : vector<32x32xf32> to vector<32xf32>
    %213 = vector.shape_cast %212 : vector<32xf32> to vector<32x1xf32>
    %cst_76 = arith.constant 3.200000e+01 : f32
    %214 = vector.broadcast %cst_76 : f32 to vector<32x1xf32>
    %215 = arith.divf %213, %214 : vector<32x1xf32>
    %216 = vector.broadcast %208 : vector<32x1xf32> to vector<32x32xf32>
    %217 = arith.subf %204, %216 : vector<32x32xf32>
    %cst_77 = arith.constant 9.99999974E-6 : f32
    %218 = vector.broadcast %cst_77 : f32 to vector<32x1xf32>
    %219 = arith.addf %215, %218 : vector<32x1xf32>
    %220 = math.rsqrt %219 : vector<32x1xf32>
    %221 = vector.broadcast %220 : vector<32x1xf32> to vector<32x32xf32>
    %222 = arith.mulf %217, %221 : vector<32x32xf32>
    %c3_78 = arith.constant 3 : index
    %c0_79 = arith.constant 0 : index
    %c0_80 = arith.constant 0 : index
    %223 = vector.load %arg8[%c3_78, %c0_79, %c0_80] : memref<4x1x32xf32, #tpu.memory_space<vmem>>, vector<1x1x32xf32>
    %224 = vector.shape_cast %223 : vector<1x1x32xf32> to vector<1x32xf32>
    %225 = vector.broadcast %224 : vector<1x32xf32> to vector<32x32xf32>
    %226 = arith.mulf %222, %225 : vector<32x32xf32>
    %c3_81 = arith.constant 3 : index
    %c0_82 = arith.constant 0 : index
    %c0_83 = arith.constant 0 : index
    %227 = vector.load %arg9[%c3_81, %c0_82, %c0_83] : memref<4x1x32xf32, #tpu.memory_space<vmem>>, vector<1x1x32xf32>
    %228 = vector.shape_cast %227 : vector<1x1x32xf32> to vector<1x32xf32>
    %229 = vector.broadcast %228 : vector<1x32xf32> to vector<32x32xf32>
    %230 = arith.addf %226, %229 : vector<32x32xf32>
    %cst_84 = arith.constant 5.000000e-01 : f32
    %231 = vector.broadcast %cst_84 : f32 to vector<32x32xf32>
    %232 = arith.mulf %231, %230 : vector<32x32xf32>
    %cst_85 = arith.constant 0.707106769 : f32
    %233 = vector.broadcast %cst_85 : f32 to vector<32x32xf32>
    %234 = arith.mulf %230, %233 : vector<32x32xf32>
    %235 = math.erf %234 : vector<32x32xf32>
    %cst_86 = arith.constant 1.000000e+00 : f32
    %236 = vector.broadcast %cst_86 : f32 to vector<32x32xf32>
    %237 = arith.addf %236, %235 : vector<32x32xf32>
    %238 = arith.mulf %232, %237 : vector<32x32xf32>
    %239 = vector.broadcast %1 : vector<32x1xf32> to vector<32x32xf32>
    %240 = arith.mulf %238, %239 : vector<32x32xf32>
    %241 = arith.addf %122, %240 : vector<32x32xf32>
    %c0_87 = arith.constant 0 : index
    %c0_88 = arith.constant 0 : index
    %242 = vector.load %arg10[%c0_87, %c0_88] : memref<1x32xf32, #tpu.memory_space<vmem>>, vector<1x32xf32>
    %cst_89 = arith.constant dense<0.000000e+00> : vector<1x32xf32>
    %243 = tpu.matmul %242, %241, %cst_89 {dimension_numbers = #tpu.dot_dimension_numbers<[1], [1], [0], [0], [0, 0, 1, 0], [], []>} : vector<1x32xf32>, vector<32x32xf32>, vector<1x32xf32> -> vector<1x32xf32>
    %c0_90 = arith.constant 0 : index
    %c0_91 = arith.constant 0 : index
    %244 = vector.load %arg11[%c0_90, %c0_91] : memref<1x1xf32, #tpu.memory_space<vmem>>, vector<1x1xf32>
    %245 = vector.broadcast %244 : vector<1x1xf32> to vector<1x32xf32>
    %246 = arith.addf %243, %245 : vector<1x32xf32>
    %c0_92 = arith.constant 0 : index
    %c0_93 = arith.constant 0 : index
    %247 = vector.load %arg3[%c0_92, %c0_93] : memref<1x32xf32, #tpu.memory_space<vmem>>, vector<1x32xf32>
    %248 = arith.mulf %246, %247 : vector<1x32xf32>
    %c0_94 = arith.constant 0 : index
    %c0_95 = arith.constant 0 : index
    %249 = vector.load %arg12[%c0_94, %c0_95] : memref<1x32xf32, #tpu.memory_space<vmem>>, vector<1x32xf32>
    tpu.vector_store %arg12[%c0_94, %c0_95], %248 {strides = array<i32>} : memref<1x32xf32, #tpu.memory_space<vmem>>, vector<1x32xf32>,
    return
  }
  func.func @transform_0(%arg0: i32) -> (i32, i32) {
    %c0_i32 = arith.constant 0 : i32
    %c0_i32_0 = arith.constant 0 : i32
    %c0_i32_1 = arith.constant 0 : i32
    return %c0_i32, %c0_i32_0 : i32, i32
  }
  func.func @transform_1(%arg0: i32) -> (i32, i32) {
    %c0_i32 = arith.constant 0 : i32
    %c0_i32_0 = arith.constant 0 : i32
    %c0_i32_1 = arith.constant 0 : i32
    return %c0_i32, %c0_i32_0 : i32, i32
  }
  func.func @transform_2(%arg0: i32) -> (i32, i32) {
    %c0_i32 = arith.constant 0 : i32
    %c0_i32_0 = arith.constant 0 : i32
    %c0_i32_1 = arith.constant 0 : i32
    return %c0_i32, %c0_i32_0 : i32, i32
  }
  func.func @transform_3(%arg0: i32) -> (i32, i32) {
    %c0_i32 = arith.constant 0 : i32
    %c0_i32_0 = arith.constant 0 : i32
    %c0_i32_1 = arith.constant 0 : i32
    return %c0_i32, %c0_i32_0 : i32, i32
  }
  func.func @transform_4(%arg0: i32) -> (i32, i32) {
    %c0_i32 = arith.constant 0 : i32
    %c0_i32_0 = arith.constant 0 : i32
    %c0_i32_1 = arith.constant 0 : i32
    return %c0_i32, %c0_i32_0 : i32, i32
  }
  func.func @transform_5(%arg0: i32) -> (i32, i32, i32) {
    %c0_i32 = arith.constant 0 : i32
    %c0_i32_0 = arith.constant 0 : i32
    %c0_i32_1 = arith.constant 0 : i32
    %c0_i32_2 = arith.constant 0 : i32
    return %c0_i32, %c0_i32_0, %c0_i32_1 : i32, i32, i32
  }
  func.func @transform_6(%arg0: i32) -> (i32, i32, i32) {
    %c0_i32 = arith.constant 0 : i32
    %c0_i32_0 = arith.constant 0 : i32
    %c0_i32_1 = arith.constant 0 : i32
    %c0_i32_2 = arith.constant 0 : i32
    return %c0_i32, %c0_i32_0, %c0_i32_1 : i32, i32, i32
  }
  func.func @transform_7(%arg0: i32) -> (i32, i32, i32) {
    %c0_i32 = arith.constant 0 : i32
    %c0_i32_0 = arith.constant 0 : i32
    %c0_i32_1 = arith.constant 0 : i32
    %c0_i32_2 = arith.constant 0 : i32
    return %c0_i32, %c0_i32_0, %c0_i32_1 : i32, i32, i32
  }
  func.func @transform_8(%arg0: i32) -> (i32, i32, i32) {
    %c0_i32 = arith.constant 0 : i32
    %c0_i32_0 = arith.constant 0 : i32
    %c0_i32_1 = arith.constant 0 : i32
    %c0_i32_2 = arith.constant 0 : i32
    return %c0_i32, %c0_i32_0, %c0_i32_1 : i32, i32, i32
  }
  func.func @transform_9(%arg0: i32) -> (i32, i32) {
    %c0_i32 = arith.constant 0 : i32
    %c0_i32_0 = arith.constant 0 : i32
    %c0_i32_1 = arith.constant 0 : i32
    return %c0_i32, %c0_i32_0 : i32, i32
  }
  func.func @transform_10(%arg0: i32) -> (i32, i32) {
    %c0_i32 = arith.constant 0 : i32
    %c0_i32_0 = arith.constant 0 : i32
    %c0_i32_1 = arith.constant 0 : i32
    return %c0_i32, %c0_i32_0 : i32, i32
  }
  func.func @transform_11(%arg0: i32) -> (i32, i32) {
    %c0_i32 = arith.constant 0 : i32
    %c0_i32_0 = arith.constant 0 : i32
    %c0_i32_1 = arith.constant 0 : i32
    return %c0_i32, %c0_i32_0 : i32, i32
  }
}

</mosaic_0001>

<bundles_post_ra>
// kernel: duration_predictor.1
= control target key start
LH: loop header
LB: loop body
LE: loop exit
PB: predicated region body
PF: predicated region fallthrough
CT: control target
= control target key end

     0   :  { %v2225_v1 = vmov 0   ;;  %vm75_vm0 = vcmask 261120   ;;  %vm163_vm1 = vcmask 1046528   ;;  %vm107_vm2 = vcmask 1040384   ;;  %s3210_s5 = inlined_call_operand.vmem [shape: bf16[4,32,128], index: 5, kind: input, shape index: {}]   ;;  %s3211_s3 = inlined_call_operand.vmem [shape: f32[32,1], index: 3, kind: input, shape index: {}]   ;;  %s3212_s0 = inlined_call_operand.vmem [shape: f32[32,32], index: 0, kind: input, shape index: {}]   ;;  %s3213_s4 = inlined_call_operand.vmem [shape: f32[32,1], index: 4, kind: input, shape index: {}]   ;;  %s3214_s6 = inlined_call_operand.vmem [shape: f32[4,1,32], index: 6, kind: input, shape index: {}]   ;;  %s3215_s8 = inlined_call_operand.vmem [shape: f32[4,1,32], index: 8, kind: input, shape index: {}]   ;;  %s3216_s7 = inlined_call_operand.vmem [shape: f32[4,1,32], index: 7, kind: input, shape index: {}]   ;;  %s3217_s1 = inlined_call_operand.vmem [shape: f32[32,1], index: 1, kind: input, shape index: {}]   ;;  %s3218_s10 = inlined_call_operand.<no memory space> [shape: f32[1,1], index: 10, kind: input, shape index: {}]   ;;  %s3219_s9 = inlined_call_operand.vmem [shape: f32[1,32], index: 9, kind: input, shape index: {}]   ;;  %s3220_s2 = inlined_call_operand.vmem [shape: f32[1,32], index: 2, kind: input, shape index: {}]   ;;  %s3221_s11 = inlined_call_operand.vmem [shape: f32[1,32], index: 11, kind: output, shape index: {}]  }
   0x1   :  { %v2129_v0 = vld [vmem:[%s3210_s5 + $0x8] sm:$0xff]  ;;  %2140 = vset.pattern.permute.xlu0 %v2225_v1  ;;  %v49_v2 = vld [vmem:[%s3211_s3] sm:$0xff]  ;;  %2141 = vset.pattern.permute.xlu1 %v2225_v1  ;;  %v51_v7 = vld [vmem:[%s3211_s3 + $0x10] sm:$0xff] }
   0x2   :  { %121 = vperm.xlu0 %2140, %v49_v2   ;;  %2142 = vset.pattern.permute.xlu2 %v2225_v1  ;;  %v2128_v3 = vld [vmem:[%s3210_s5] sm:$0xff]  ;;  %v42_v5 = vld [vmem:[%s3212_s0 + $0x8] sm:$0xff]  ;;  %v52_v11 = vld [vmem:[%s3211_s3 + $0x18] sm:$0xff] }
   0x3   :  { %88 = vmatpush.bf16.msra.mxu0 %v2129_v0  ;;  %v41_v4 = vld [vmem:[%s3212_s0] sm:$0xff]  ;;  %131 = vperm.xlu2 %2142, %v51_v7   ;;  %v50_v9 = vld [vmem:[%s3211_s3 + $0x8] sm:$0xff]  ;;  %v55_v12 = vld [vmem:[%s3213_s4 + $0x10] sm:$0xff]  ;;  %s2226_s3 = smov 96  }
   0x4   :  { %v53_v6 = vld [vmem:[%s3213_s4] sm:$0xff]  ;;  %v57_v8 = vpack.c.bf16 %v42_v5, %v41_v4  ;;  %v54_v10 = vld [vmem:[%s3213_s4 + $0x8] sm:$0xff]  ;;  %v56_v13 = vld [vmem:[%s3213_s4 + $0x18] sm:$0xff]  ;;  %s2227_s4 = smov 32  }
   0x5   :  { %179 = vperm.xlu1 %2141, %v53_v6   ;;  %v43_v14 = vld [vmem:[%s3212_s0 + $0x10] sm:$0xff]  ;;  %v44_v15 = vld [vmem:[%s3212_s0 + $0x18] sm:$0xff]  ;;  %v2143_v34 = vld [vmem:[%s3214_s6] ss:$0 sm:$0xff] }
   0x6   :  { %v58_v16 = vpack.c.bf16 %v44_v15, %v43_v14 }
   0x7   :  { %89 = vmatpush.bf16.msra.mxu0 %v2128_v3 }
   0xa   :  { %2054 = vmatmul.msk.bf16.vlgmr.msra.gmra.mxu0 %vm75_vm0, %v57_v8  ;;  %126 = vperm.xlu0 %2140, %v50_v9  }
   0xb   :  { %136 = vperm.xlu2 %2142, %v52_v11  }
   0xd   :  { %184 = vperm.xlu1 %2141, %v54_v10  }
  0x12   :  { %189 = vperm.xlu0 %2140, %v55_v12  }
  0x15   :  { %194 = vperm.xlu1 %2141, %v56_v13  }
  0x1a   :  { %2055 = vmatmul.msk.bf16.gmra.mxu0 %vm75_vm0, %v58_v16 }
  0x5d   :  { %v2347_v33 = vpop.permute.xlu2 %131 }
  0x65   :  { %v2372_v51 = vpop.permute.xlu2 %136 }
  0x74   :  { %v2333_v18 = vpop.permute.xlu0 %121 }
  0x77   :  { %v2335_v19 = vpop.permute.xlu1 %179 }
  0x7c   :  { %v2337_v25 = vpop.permute.xlu0 %126 }
  0x7f   :  { %v2345_v30 = vpop.permute.xlu1 %184 }
  0x84   :  { %v2358_v42 = vpop.permute.xlu0 %189 }
  0x87   :  { %v91_v17 = vpop.f32.mrf.mxu0  ;;  %v2356_v41 = vpop.permute.xlu1 %194 }
  0x88   :  { %v108_v21 = vrot.slane %v91_v17, 7  ;;  %v164_v22 = vrot.slane %v91_v17, 1 }
  0x8f   :  { %v93_v20 = vpop.f32.mrf.mxu0 }
  0x90   :  { %v109_v23 = vrot.slane %v93_v20, 7  ;;  %v165_v24 = vrot.slane %v93_v20, 1 }
  0x92   :  { %v166_v26 = vsel %vm163_vm1, %v164_v22, %v165_v24  ;;  %v110_v27 = vsel %vm107_vm2, %v108_v21, %v109_v23 }
  0x93   :  { %v197_v28 = vmul.f32 %v2335_v19, %v166_v26  ;;  %v140_v29 = vmul.f32 %v2337_v25, %v110_v27 }
  0x95   :  { %205 = vrot.lane.b32.xlu1 %v197_v28, %s2226_s3  ;;  %149 = vrot.lane.b32.xlu0 %v140_v29, %s2227_s4 }
  0x97   :  { %v96_v31 = vpop.f32.mrf.mxu0 }
  0x98   :  { %v111_v32 = vrot.slane %v96_v31, 7  ;;  %v167_v38 = vrot.slane %v96_v31, 1 }
  0x9a   :  { %v112_v35 = vsel %vm107_vm2, %v109_v23, %v111_v32  ;;  %v168_v49 = vsel %vm163_vm1, %v165_v24, %v167_v38 }
  0x9b   :  { %v141_v36 = vmul.f32 %v2347_v33, %v112_v35  ;;  %v198_v50 = vmul.f32 %v2345_v30, %v168_v49 }
  0x9d   :  { %224 = vrot.lane.b32.xlu0 %v2143_v34, %s2227_s4  ;;  %151 = vrot.lane.b32.xlu1 %v141_v36, %s2227_s4 }
  0x9f   :  { %v98_v37 = vpop.f32.mrf.mxu0 }
  0xa0   :  { %v102_v39 = vrot.slane %v98_v37, 7  ;;  %v169_v40 = vrot.slane %v98_v37, 1 }
  0xa2   :  { %v176_v43 = vsel %vm163_vm1, %v169_v40, %v164_v22  ;;  %v170_v44 = vsel %vm163_vm1, %v167_v38, %v169_v40  ;;  %v118_v45 = vsel %vm107_vm2, %v102_v39, %v108_v21  ;;  %v113_v52 = vsel %vm107_vm2, %v111_v32, %v102_v39 }
  0xa3   :  { %v200_v46 = vmul.f32 %v2356_v41, %v176_v43  ;;  %v199_v47 = vmul.f32 %v2358_v42, %v170_v44  ;;  %v139_v48 = vmul.f32 %v2333_v18, %v118_v45  ;;  %v142_v53 = vmul.f32 %v2372_v51, %v113_v52 }
  0xa4   :  { %v2228_v21 = vmov 32.0  }
  0xa5   :  { %211 = vrot.lane.b32.xlu1 %v200_v46, %s2226_s3  ;;  %209 = vrot.lane.b32.xlu0 %v199_v47, %s2226_s3  ;;  %2155 = vrcp.f32 %v2228_v21 }
  0xa6   :  { %147 = vrot.lane.b32.xlu2 %v139_v48, %s2227_s4 }
  0xab   :  { %v2156_v22 = vpop.eup %2155 }
  0xac   :  { %v260_v23 = vmul.f32 32.0, %v2156_v22  ;;  %vm264_vm3 = vweird.f32 %v2156_v22 }
  0xae   :  { %207 = vrot.lane.b32.xlu2 %v198_v50, %s2226_s3  ;;  %v261_v24 = vsub.f32 1.0, %v260_v23 }
  0xb0   :  { %v262_v26 = vmul.f32 %v2156_v22, %v261_v24 }
  0xb2   :  { %v263_v27 = vadd.f32 %v2156_v22, %v262_v26 }
  0xb4   :  { %v2385_v28 = vsel %vm264_vm3, %v2156_v22, %v263_v27 }
  0xb6   :  { %153 = vrot.lane.b32.xlu2 %v142_v53, %s2227_s4 }
 0x100   :  { %v148_v54 = vpop.permute.xlu2 %147 }
 0x101   :  { %v159_v59 = vadd.f32 %v148_v54, %v91_v17 }
 0x107   :  { %v206_v55 = vpop.permute.xlu1 %205  ;;  %v150_v56 = vpop.permute.xlu0 %149 }
 0x108   :  { %v208_v57 = vpop.permute.xlu2 %207  ;;  %v160_v58 = vadd.f32 %v150_v56, %v93_v20  ;;  %v217_v60 = vadd.f32 %v206_v55, %v159_v59  ;;  %v2144_v56 = vld [vmem:[%s3215_s8] ss:$0 sm:$0xff] }
 0x109   :  { %v2145_v59 = vld [vmem:[%s3216_s7] ss:$0 sm:$0xff] }
 0x10a   :  { %v218_v61 = vadd.f32 %v208_v57, %v160_v58  ;;  %v47_v57 = vld [vmem:[%s3217_s1 + $0x10] sm:$0xff] }
 0x10f   :  { %v225_v62 = vpop.permute.xlu0 %224  ;;  %v152_v63 = vpop.permute.xlu1 %151 }
 0x110   :  { %v228_v0 = vadd.f32 %v225_v62, %v218_v61  ;;  %v227_v1 = vadd.f32 %v225_v62, %v217_v60  ;;  %v154_v2 = vpop.permute.xlu2 %153  ;;  %v161_v3 = vadd.f32 %v152_v63, %v96_v31  ;;  %v46_v61 = vld [vmem:[%s3217_s1 + $0x8] sm:$0xff]  ;;  %v45_v63 = vld [vmem:[%s3217_s1] sm:$0xff] }
 0x111   :  { %v162_v4 = vadd.f32 %v154_v2, %v98_v37 }
 0x112   :  { %237 = vrot.lane.b32.xlu0 %v228_v0, %s2226_s3  ;;  %235 = vrot.lane.b32.xlu2 %v227_v1, %s2226_s3 }
 0x117   :  { %v212_v5 = vpop.permute.xlu1 %211  ;;  %v210_v6 = vpop.permute.xlu0 %209 }
 0x118   :  { %v220_v7 = vadd.f32 %v212_v5, %v162_v4  ;;  %v219_v8 = vadd.f32 %v210_v6, %v161_v3 }
 0x11a   :  { %v230_v9 = vadd.f32 %v225_v62, %v220_v7  ;;  %v229_v10 = vadd.f32 %v225_v62, %v219_v8  ;;  %v48_v62 = vld [vmem:[%s3217_s1 + $0x18] sm:$0xff] }
 0x11c   :  { %239 = vrot.lane.b32.xlu1 %v229_v10, %s2226_s3  ;;  %241 = vrot.lane.b32.xlu2 %v230_v9, %s2226_s3 }
 0x16c   :  { %v236_v11 = vpop.permute.xlu2 %235 }
 0x16d   :  { %v247_v12 = vsel %vm75_vm0, %v236_v11, 0.0 }
 0x16e   :  { %248 = vadd.xlane.f32.xlu0 %v247_v12 }
 0x176   :  { %v242_v17 = vpop.permute.xlu2 %241 }
 0x177   :  { %v256_v20 = vsel %vm75_vm0, %v242_v17, 0.0 }
 0x184   :  { %v238_v13 = vpop.permute.xlu0 %237 }
 0x185   :  { %v250_v14 = vsel %vm75_vm0, %v238_v13, 0.0 }
 0x186   :  { %251 = vadd.xlane.f32.xlu1 %v250_v14 }
 0x18e   :  { %v240_v15 = vpop.permute.xlu1 %239 }
 0x18f   :  { %v253_v16 = vsel %vm75_vm0, %v240_v15, 0.0 }
 0x190   :  { %254 = vadd.xlane.f32.xlu2 %v253_v16 }
 0x198   :  { %257 = vadd.xlane.f32.xlu2 %v256_v20 }
 0x1e1   :  { %v249_v29 = vpop.xlane.xlu0 %248 }
 0x1e2   :  { %v266_v31 = vmul.f32 %v2385_v28, %v249_v29 }
 0x1e4   :  { %v2388_v32 = vsub.f32 %v227_v1, %v266_v31 }
 0x1e6   :  { %v274_v34 = vmul.f32 %v2388_v32, %v2388_v32 }
 0x1e8   :  { %282 = vrot.lane.b32.xlu0 %v274_v34, %s2226_s3 }
 0x1f9   :  { %v252_v35 = vpop.xlane.xlu1 %251 }
 0x1fa   :  { %v267_v36 = vmul.f32 %v2385_v28, %v252_v35 }
 0x1fc   :  { %v2394_v37 = vsub.f32 %v228_v0, %v267_v36 }
 0x1fe   :  { %v275_v38 = vmul.f32 %v2394_v37, %v2394_v37 }
 0x200   :  { %284 = vrot.lane.b32.xlu1 %v275_v38, %s2226_s3 }
 0x203   :  { %v255_v39 = vpop.xlane.xlu2 %254 }
 0x204   :  { %v268_v40 = vmul.f32 %v2385_v28, %v255_v39 }
 0x206   :  { %v2400_v43 = vsub.f32 %v229_v10, %v268_v40 }
 0x208   :  { %v276_v44 = vmul.f32 %v2400_v43, %v2400_v43 }
 0x20a   :  { %286 = vrot.lane.b32.xlu2 %v276_v44, %s2226_s3 }
 0x20b   :  { %v258_v45 = vpop.xlane.xlu2 %257 }
 0x20c   :  { %v269_v46 = vmul.f32 %v2385_v28, %v258_v45 }
 0x20e   :  { %v2406_v47 = vsub.f32 %v230_v9, %v269_v46 }
 0x210   :  { %v277_v48 = vmul.f32 %v2406_v47, %v2406_v47 }
 0x212   :  { %288 = vrot.lane.b32.xlu0 %v277_v48, %s2226_s3 }
 0x25a   :  { %v283_v49 = vpop.permute.xlu0 %282 }
 0x25b   :  { %v294_v50 = vsel %vm75_vm0, %v283_v49, 0.0 }
 0x25c   :  { %295 = vadd.xlane.f32.xlu1 %v294_v50 }
 0x264   :  { %v287_v52 = vpop.permute.xlu2 %286 }
 0x265   :  { %v300_v53 = vsel %vm75_vm0, %v287_v52, 0.0 }
 0x266   :  { %301 = vadd.xlane.f32.xlu2 %v300_v53 }
 0x272   :  { %v285_v54 = vpop.permute.xlu1 %284 }
 0x273   :  { %v297_v55 = vsel %vm75_vm0, %v285_v54, 0.0 }
 0x274   :  { %298 = vadd.xlane.f32.xlu0 %v297_v55 }
 0x27e   :  { %371 = vrot.lane.b32.xlu2 %v2144_v56, %s2227_s4 }
 0x284   :  { %v289_v58 = vpop.permute.xlu0 %288 }
 0x285   :  { %v303_v60 = vsel %vm75_vm0, %v289_v58, 0.0 }
 0x286   :  { %304 = vadd.xlane.f32.xlu1 %v303_v60  ;;  %566 = vperm.xlu2 %2142, %v47_v57  }
 0x288   :  { %361 = vrot.lane.b32.xlu0 %v2145_v59, %s2227_s4 }
 0x290   :  { %561 = vperm.xlu0 %2140, %v46_v61  }
 0x298   :  { %571 = vperm.xlu0 %2140, %v48_v62  }
 0x29f   :  { %556 = vperm.xlu1 %2141, %v45_v63  }
 0x2cf   :  { %v296_v0 = vpop.xlane.xlu1 %295 }
 0x2d0   :  { %v306_v1 = vmul.f32 %v296_v0, %v2385_v28 }
 0x2d2   :  { %v310_v2 = vadd.f32 1e-05, %v306_v1 }
 0x2d4   :  { %2157 = vrsqrt.f32 %v310_v2  ;;  %vm320_vm6 = vweird.f32 %v310_v2 }
 0x2d9   :  { %v302_v3 = vpop.xlane.xlu2 %301 }
 0x2da   :  { %v308_v4 = vmul.f32 %v302_v3, %v2385_v28  ;;  %v2158_v6 = vpop.eup %2157 }
 0x2db   :  { %v315_v7 = vmul.f32 %v2158_v6, %v310_v2  ;;  %vm321_vm4 = vweird.f32 %v2158_v6 }
 0x2dc   :  { %v312_v5 = vadd.f32 1e-05, %v308_v4  ;;  %vm322_vm7 = vmor %vm320_vm6, %vm321_vm4 }
 0x2dd   :  { %v316_v10 = vmul.f32 %v2158_v6, %v315_v7 }
 0x2de   :  { %2159 = vrsqrt.f32 %v312_v5  ;;  %vm340_vm8 = vweird.f32 %v312_v5 }
 0x2df   :  { %v317_v14 = vmul.f32 0.5, %v316_v10 }
 0x2e1   :  { %v318_v17 = vsub.f32 1.5, %v317_v14  ;;  %v372_v48 = vpop.permute.xlu2 %371 }
 0x2e3   :  { %v319_v22 = vmul.f32 %v2158_v6, %v318_v17 }
 0x2e4   :  { %v2160_v8 = vpop.eup %2159 }
 0x2e5   :  { %v335_v9 = vmul.f32 %v2160_v8, %v312_v5  ;;  %vm341_vm5 = vweird.f32 %v2160_v8  ;;  %v323_v27 = vsel %vm322_vm7, %v2158_v6, %v319_v22 }
 0x2e6   :  { %vm342_vm9 = vmor %vm340_vm8, %vm341_vm5  ;;  %v354_v36 = vmul.f32 %v323_v27, %v2388_v32 }
 0x2e7   :  { %v336_v11 = vmul.f32 %v2160_v8, %v335_v9  ;;  %v299_v12 = vpop.xlane.xlu0 %298 }
 0x2e8   :  { %v307_v13 = vmul.f32 %v299_v12, %v2385_v28 }
 0x2e9   :  { %v337_v15 = vmul.f32 0.5, %v336_v11 }
 0x2ea   :  { %v311_v16 = vadd.f32 1e-05, %v307_v13 }
 0x2eb   :  { %v338_v20 = vsub.f32 1.5, %v337_v15 }
 0x2ec   :  { %2161 = vrsqrt.f32 %v311_v16  ;;  %vm330_vm11 = vweird.f32 %v311_v16 }
 0x2ed   :  { %v339_v23 = vmul.f32 %v2160_v8, %v338_v20 }
 0x2ef   :  { %v343_v29 = vsel %vm342_vm9, %v2160_v8, %v339_v23 }
 0x2f0   :  { %v356_v38 = vmul.f32 %v343_v29, %v2400_v43 }
 0x2f2   :  { %v2162_v21 = vpop.eup %2161 }
 0x2f3   :  { %v325_v24 = vmul.f32 %v2162_v21, %v311_v16  ;;  %vm331_vm10 = vweird.f32 %v2162_v21 }
 0x2f4   :  { %vm332_vm12 = vmor %vm330_vm11, %vm331_vm10 }
 0x2f5   :  { %v326_v26 = vmul.f32 %v2162_v21, %v325_v24 }
 0x2f7   :  { %v327_v31 = vmul.f32 0.5, %v326_v26 }
 0x2f9   :  { %v328_v34 = vsub.f32 1.5, %v327_v31  ;;  %v305_v35 = vpop.xlane.xlu1 %304 }
 0x2fa   :  { %v309_v39 = vmul.f32 %v305_v35, %v2385_v28  ;;  %v362_v40 = vpop.permute.xlu0 %361 }
 0x2fb   :  { %v329_v44 = vmul.f32 %v2162_v21, %v328_v34  ;;  %v364_v45 = vmul.f32 %v362_v40, %v354_v36  ;;  %v366_v46 = vmul.f32 %v362_v40, %v356_v38 }
 0x2fc   :  { %v313_v49 = vadd.f32 1e-05, %v309_v39 }
 0x2fd   :  { %v333_v50 = vsel %vm332_vm12, %v2162_v21, %v329_v44  ;;  %v2441_v52 = vadd.f32 %v372_v48, %v364_v45  ;;  %v2443_v53 = vadd.f32 %v372_v48, %v366_v46 }
 0x2fe   :  { %2163 = vrsqrt.f32 %v313_v49  ;;  %v355_v32 = vmul.f32 %v333_v50, %v2394_v37  ;;  %vm350_vm14 = vweird.f32 %v313_v49 }
 0x2ff   :  { %v2447_v43 = vmul.f32 0.70710677, %v2441_v52  ;;  %v2450_v54 = vmul.f32 0.70710677, %v2443_v53 }
 0x300   :  { %v365_v55 = vmul.f32 %v362_v40, %v355_v32 }
 0x301   :  { %v386_v56 = vmul.f32 %v2447_v43, %v2447_v43  ;;  %v466_v57 = vmul.f32 %v2450_v54, %v2450_v54 }
 0x302   :  { %v2456_v58 = vadd.f32 %v372_v48, %v365_v55 }
 0x303   :  { %v2458_v59 = vmin.f32 %v386_v56, 16.0  ;;  %v2460_v60 = vmin.f32 %v466_v57, 16.0 }
 0x304   :  { %v2164_v37 = vpop.eup %2163  ;;  %v2463_v61 = vmul.f32 0.70710677, %v2456_v58 }
 0x305   :  { %v345_v62 = vmul.f32 %v2164_v37, %v313_v49  ;;  %v388_v63 = vmul.f32 2.1237322e-06, %v2458_v59  ;;  %v399_v1 = vmul.f32 3.8918573e-05, %v2458_v59  ;;  %v479_v2 = vmul.f32 3.8918573e-05, %v2460_v60 }
 0x306   :  { %v426_v0 = vmul.f32 %v2463_v61, %v2463_v61  ;;  %vm351_vm13 = vweird.f32 %v2164_v37  ;;  %v468_v22 = vmul.f32 2.1237322e-06, %v2460_v60 }
 0x307   :  { %v346_v3 = vmul.f32 %v2164_v37, %v345_v62  ;;  %v389_v4 = vadd.f32 0.00028619796, %v388_v63  ;;  %v400_v6 = vadd.f32 0.001143296, %v399_v1  ;;  %v480_v7 = vadd.f32 0.001143296, %v479_v2  ;;  %vm352_vm15 = vmor %vm350_vm14, %vm351_vm13 }
 0x308   :  { %v2470_v5 = vmin.f32 %v426_v0, 16.0  ;;  %v469_v44 = vadd.f32 0.00028619796, %v468_v22 }
 0x309   :  { %v347_v8 = vmul.f32 0.5, %v346_v3  ;;  %v390_v9 = vmul.f32 %v389_v4, %v2458_v59  ;;  %v401_v12 = vmul.f32 %v400_v6, %v2458_v59  ;;  %v481_v13 = vmul.f32 %v480_v7, %v2460_v60 }
 0x30a   :  { %v428_v10 = vmul.f32 2.1237322e-06, %v2470_v5  ;;  %v439_v11 = vmul.f32 3.8918573e-05, %v2470_v5  ;;  %v470_v62 = vmul.f32 %v469_v44, %v2460_v60 }
 0x30b   :  { %v348_v14 = vsub.f32 1.5, %v347_v8  ;;  %v402_v17 = vadd.f32 0.014752088, %v401_v12  ;;  %v391_v21 = vadd.f32 0.0036580483, %v390_v9 }
 0x30c   :  { %v429_v15 = vadd.f32 0.00028619796, %v428_v10  ;;  %v440_v16 = vadd.f32 0.001143296, %v439_v11  ;;  %v482_v23 = vadd.f32 0.014752088, %v481_v13 }
 0x30d   :  { %v349_v20 = vmul.f32 %v2164_v37, %v348_v14  ;;  %v403_v27 = vmul.f32 %v402_v17, %v2458_v59  ;;  %v392_v39 = vmul.f32 %v391_v21, %v2458_v59  ;;  %v471_v7 = vadd.f32 0.0036580483, %v470_v62 }
 0x30e   :  { %v430_v24 = vmul.f32 %v429_v15, %v2470_v5  ;;  %v441_v26 = vmul.f32 %v440_v16, %v2470_v5  ;;  %v483_v31 = vmul.f32 %v482_v23, %v2460_v60 }
 0x30f   :  { %v353_v29 = vsel %vm352_vm15, %v2164_v37, %v349_v20  ;;  %v404_v38 = vadd.f32 0.112945676, %v403_v27  ;;  %v393_v37 = vadd.f32 0.05243302, %v392_v39  ;;  %v472_v16 = vmul.f32 %v471_v7, %v2460_v60 }
 0x310   :  { %v357_v34 = vmul.f32 %v353_v29, %v2406_v47  ;;  %v431_v35 = vadd.f32 0.0036580483, %v430_v24  ;;  %v442_v36 = vadd.f32 0.014752088, %v441_v26  ;;  %v484_v45 = vadd.f32 0.112945676, %v483_v31 }
 0x311   :  { %v405_v50 = vmul.f32 %v404_v38, %v2458_v59  ;;  %v394_v6 = vmul.f32 %v393_v37, %v2458_v59  ;;  %v473_v27 = vadd.f32 0.05243302, %v472_v16 }
 0x312   :  { %v367_v46 = vmul.f32 %v362_v40, %v357_v34  ;;  %v443_v49 = vmul.f32 %v442_v36, %v2470_v5  ;;  %v432_v32 = vmul.f32 %v431_v35, %v2470_v5  ;;  %v485_v55 = vmul.f32 %v484_v45, %v2460_v60 }
 0x313   :  { %v406_v47 = vadd.f32 0.4994258, %v405_v50  ;;  %v395_v15 = vadd.f32 0.18741608, %v394_v6  ;;  %v474_v50 = vmul.f32 %v473_v27, %v2460_v60 }
 0x314   :  { %v2488_v56 = vadd.f32 %v372_v48, %v367_v46  ;;  %v444_v57 = vadd.f32 0.112945676, %v443_v49  ;;  %v486_v63 = vadd.f32 0.4994258, %v485_v55  ;;  %v433_v1 = vadd.f32 0.05243302, %v432_v32 }
 0x315   :  { %v407_v2 = vmul.f32 %v406_v47, %v2458_v59  ;;  %v396_v26 = vmul.f32 %v395_v15, %v2458_v59  ;;  %v475_v7 = vadd.f32 0.18741608, %v474_v50 }
 0x316   :  { %v2492_v0 = vmul.f32 0.70710677, %v2488_v56  ;;  %v445_v40 = vmul.f32 %v444_v57, %v2470_v5  ;;  %v487_v3 = vmul.f32 %v486_v63, %v2460_v60  ;;  %v434_v12 = vmul.f32 %v433_v1, %v2470_v5 }
 0x317   :  { %v408_v8 = vadd.f32 1.0, %v407_v2  ;;  %v397_v49 = vadd.f32 1.1283791, %v396_v26 }
 0x318   :  { %v506_v48 = vmul.f32 %v2492_v0, %v2492_v0  ;;  %v446_v4 = vadd.f32 0.4994258, %v445_v40  ;;  %v2500_v9 = vadd.f32 1.0, %v487_v3  ;;  %v435_v21 = vadd.f32 0.18741608, %v434_v12 }
 0x319   :  { %2165 = vrcp.f32 %v408_v8  ;;  %v420_v38 = vand.u32 2147483648, %v408_v8  ;;  %vm414_vm3 = vweird.f32 %v408_v8  ;;  %v418_v57 = vand.u32 2147483647, %v408_v8 }
 0x31a   :  { %v2502_v10 = vmin.f32 %v506_v48, 16.0  ;;  %v447_v11 = vmul.f32 %v446_v4, %v2470_v5  ;;  %2167 = vrcp.f32 %v2500_v9  ;;  %v436_v35 = vmul.f32 %v435_v21, %v2470_v5 }
 0x31b   :  { %v421_v62 = vor.u32 1.1754944e-38, %v420_v38  ;;  %v398_v6 = vmul.f32 %v397_v49, %v2447_v43  ;;  %vm419_vm7 = vcmp.eq.f32.partialorder %v418_v57, 8.507059e+37  ;;  %v378_v38 = vmul.f32 0.5, %v2441_v52  ;;  %v2540_v57 = vpop.permute.xlu0 %561  ;;  %v2542_v52 = vpop.permute.xlu1 %556 }
 0x31c   :  { %v508_v13 = vmul.f32 2.1237322e-06, %v2502_v10  ;;  %v448_v14 = vadd.f32 1.0, %v447_v11  ;;  %v519_v17 = vmul.f32 3.8918573e-05, %v2502_v10  ;;  %vm494_vm12 = vweird.f32 %v2500_v9 }
 0x31d   :  { %v437_v47 = vadd.f32 1.1283791, %v436_v35 }
 0x31e   :  { %v509_v20 = vadd.f32 0.00028619796, %v508_v13  ;;  %2169 = vrcp.f32 %v448_v14  ;;  %v520_v22 = vadd.f32 0.001143296, %v519_v17  ;;  %v460_v40 = vand.u32 2147483648, %v448_v14 }
 0x31f   :  { %v2166_v24 = vpop.eup %2165  ;;  %v458_v48 = vand.u32 2147483647, %v448_v14  ;;  %vm454_vm8 = vweird.f32 %v448_v14 }
 0x320   :  { %v510_v23 = vmul.f32 %v509_v20, %v2502_v10  ;;  %v521_v29 = vmul.f32 %v520_v22, %v2502_v10  ;;  %v2513_v31 = vpop.eup %2167  ;;  %v410_v34 = vmul.f32 %v2166_v24, %v408_v8  ;;  %vm415_vm4 = vweird.f32 %v2166_v24 }
 0x321   :  { %v490_v46 = vmul.f32 %v2513_v31, %v2500_v9  ;;  %vm416_vm6 = vmor %vm414_vm3, %vm415_vm4  ;;  %v461_v17 = vor.u32 1.1754944e-38, %v460_v40  ;;  %v438_v22 = vmul.f32 %v437_v47, %v2463_v61  ;;  %vm459_vm10 = vcmp.eq.f32.partialorder %v458_v48, 8.507059e+37 }
 0x322   :  { %v522_v36 = vadd.f32 0.014752088, %v521_v29  ;;  %v511_v44 = vadd.f32 0.0036580483, %v510_v23  ;;  %v411_v45 = vsub.f32 1.0, %v410_v34  ;;  %vm495_vm11 = vweird.f32 %v2513_v31 }
 0x323   :  { %v491_v2 = vsub.f32 1.0, %v490_v46  ;;  %vm496_vm13 = vmor %vm494_vm12, %vm495_vm11 }
 0x324   :  { %v2170_v39 = vpop.eup %2169  ;;  %v523_v32 = vmul.f32 %v522_v36, %v2502_v10  ;;  %v412_v55 = vmul.f32 %v2166_v24, %v411_v45  ;;  %v512_v63 = vmul.f32 %v511_v44, %v2502_v10  ;;  %v379_v44 = vmul.f32 0.5, %v2456_v58 }
 0x325   :  { %v450_v59 = vmul.f32 %v2170_v39, %v448_v14  ;;  %vm455_vm5 = vweird.f32 %v2170_v39  ;;  %v492_v21 = vmul.f32 %v2513_v31, %v491_v2  ;;  %v2131_v14 = vld [vmem:[%s3210_s5 + $0x18] sm:$0xff] }
 0x326   :  { %v524_v37 = vadd.f32 0.112945676, %v523_v32  ;;  %v413_v1 = vadd.f32 %v2166_v24, %v412_v55  ;;  %v513_v16 = vadd.f32 0.05243302, %v512_v63  ;;  %vm456_vm9 = vmor %vm454_vm8, %vm455_vm5  ;;  %615 = vmatpush.bf16.msra.mxu1 %v2131_v14 }
 0x327   :  { %v451_v5 = vsub.f32 1.0, %v450_v59  ;;  %v493_v36 = vadd.f32 %v2513_v31, %v492_v21 }
 0x328   :  { %v525_v4 = vmul.f32 %v524_v37, %v2502_v10  ;;  %v417_v11 = vsel %vm416_vm6, %v2166_v24, %v413_v1  ;;  %v476_v24 = vmul.f32 %v475_v7, %v2460_v60  ;;  %v514_v34 = vmul.f32 %v513_v16, %v2502_v10 }
 0x329   :  { %v452_v3 = vmul.f32 %v2170_v39, %v451_v5  ;;  %v422_v15 = vsel %vm419_vm7, %v421_v62, %v417_v11  ;;  %v498_v60 = vand.u32 2147483647, %v2500_v9  ;;  %v497_v59 = vsel %vm496_vm13, %v2513_v31, %v493_v36 }
 0x32a   :  { %v526_v13 = vadd.f32 0.4994258, %v525_v4  ;;  %v423_v20 = vmul.f32 %v422_v15, %v398_v6  ;;  %v477_v49 = vadd.f32 1.1283791, %v476_v24  ;;  %v515_v50 = vadd.f32 0.18741608, %v514_v34 }
 0x32b   :  { %v453_v12 = vadd.f32 %v2170_v39, %v452_v3  ;;  %vm499_vm14 = vcmp.eq.f32.partialorder %v498_v60, 8.507059e+37  ;;  %v380_v16 = vmul.f32 0.5, %v2443_v53  ;;  %v2130_v53 = vld [vmem:[%s3210_s5 + $0x10] sm:$0xff] }
 0x32c   :  { %v527_v8 = vmul.f32 %v526_v13, %v2502_v10  ;;  %v2056_v26 = vclamps-f32 %v423_v20, 1.0  ;;  %v478_v37 = vmul.f32 %v477_v49, %v2450_v54  ;;  %v516_v62 = vmul.f32 %v515_v50, %v2502_v10  ;;  %616 = vmatpush.bf16.msra.mxu1 %v2130_v53  ;;  %v2146_v49 = vld [vmem:[%s3214_s6 + $0x1] ss:$0 sm:$0xff] }
 0x32d   :  { %v457_v23 = vsel %vm456_vm9, %v2170_v39, %v453_v12  ;;  %v500_v39 = vand.u32 2147483648, %v2500_v9  ;;  %v381_v20 = vmul.f32 0.5, %v2488_v56 }
 0x32e   :  { %v462_v43 = vsel %vm459_vm10, %v461_v17, %v457_v23  ;;  %v528_v29 = vadd.f32 1.0, %v527_v8  ;;  %v546_v35 = vadd.f32 1.0, %v2056_v26  ;;  %v517_v3 = vadd.f32 1.1283791, %v516_v62  ;;  %v2552_v8 = vpop.permute.xlu2 %566 }
 0x32f   :  { %v463_v27 = vmul.f32 %v462_v43, %v438_v22  ;;  %v501_v55 = vor.u32 1.1754944e-38, %v500_v39  ;;  %v2554_v43 = vpop.permute.xlu0 %571 }
 0x330   :  { %2171 = vrcp.f32 %v528_v29  ;;  %v550_v46 = vmul.f32 %v546_v35, %v378_v38  ;;  %v540_v2 = vand.u32 2147483648, %v528_v29  ;;  %v538_v4 = vand.u32 2147483647, %v528_v29 }
 0x331   :  { %v2057_v61 = vclamps-f32 %v463_v27, 1.0  ;;  %v502_v58 = vsel %vm499_vm14, %v501_v55, %v497_v59  ;;  %vm534_vm3 = vweird.f32 %v528_v29  ;;  %v518_v54 = vmul.f32 %v517_v3, %v2492_v0 }
 0x332   :  { %v574_v9 = vmul.f32 %v2542_v52, %v550_v46  ;;  %v503_v1 = vmul.f32 %v502_v58, %v478_v37  ;;  %v541_v11 = vor.u32 1.1754944e-38, %v540_v2  ;;  %vm539_vm5 = vcmp.eq.f32.partialorder %v538_v4, 8.507059e+37 }
 0x333   :  { %v547_v45 = vadd.f32 1.0, %v2057_v61 }
 0x334   :  { %v2058_v7 = vclamps-f32 %v503_v1, 1.0 }
 0x335   :  { %v551_v32 = vmul.f32 %v547_v45, %v379_v44 }
 0x336   :  { %v2172_v47 = vpop.eup %2171  ;;  %v548_v15 = vadd.f32 1.0, %v2058_v7 }
 0x337   :  { %v575_v5 = vmul.f32 %v2540_v57, %v551_v32  ;;  %v530_v63 = vmul.f32 %v2172_v47, %v528_v29  ;;  %vm535_vm15 = vweird.f32 %v2172_v47 }
 0x338   :  { %vm536_vm4 = vmor %vm534_vm3, %vm535_vm15  ;;  %v552_v22 = vmul.f32 %v548_v15, %v380_v16 }
 0x339   :  { %v578_v40 = vpack.c.bf16 %v575_v5, %v574_v9  ;;  %v531_v31 = vsub.f32 1.0, %v530_v63 }
 0x33a   :  { %v576_v0 = vmul.f32 %v2552_v8, %v552_v22 }
 0x33b   :  { %587 = vrot.lane.b32.xlu1 %v578_v40, %s2226_s3  ;;  %v532_v48 = vmul.f32 %v2172_v47, %v531_v31 }
 0x33d   :  { %v533_v6 = vadd.f32 %v2172_v47, %v532_v48 }
 0x33f   :  { %v537_v12 = vsel %vm536_vm4, %v2172_v47, %v533_v6 }
 0x340   :  { %v542_v10 = vsel %vm539_vm5, %v541_v11, %v537_v12 }
 0x341   :  { %v543_v13 = vmul.f32 %v542_v10, %v518_v54 }
 0x343   :  { %v2059_v17 = vclamps-f32 %v543_v13, 1.0 }
 0x345   :  { %v549_v21 = vadd.f32 1.0, %v2059_v17 }
 0x347   :  { %v553_v23 = vmul.f32 %v549_v21, %v381_v20 }
 0x349   :  { %v577_v26 = vmul.f32 %v2554_v43, %v553_v23 }
 0x34b   :  { %v579_v14 = vpack.c.bf16 %v577_v26, %v576_v0 }
 0x34d   :  { %589 = vrot.lane.b32.xlu2 %v579_v14, %s2226_s3 }
 0x3a7   :  { %v590_v24 = vpop.permute.xlu2 %589 }
 0x3ad   :  { %v588_v56 = vpop.permute.xlu1 %587 }
 0x3ae   :  { %2072 = vmatmul.msk.bf16.vlgmr.msra.gmra.mxu1 %vm75_vm0, %v588_v56 }
 0x3be   :  { %2073 = vmatmul.msk.bf16.gmra.mxu1 %vm75_vm0, %v590_v24 }
 0x42b   :  { %v618_v27 = vpop.f32.mrf.mxu1 }
 0x42c   :  { %v634_v34 = vrot.slane %v618_v27, 7  ;;  %v669_v35 = vrot.slane %v618_v27, 1 }
 0x433   :  { %v620_v29 = vpop.f32.mrf.mxu1 }
 0x434   :  { %v635_v36 = vrot.slane %v620_v29, 7  ;;  %v670_v61 = vrot.slane %v620_v29, 1 }
 0x436   :  { %v636_v38 = vsel %vm107_vm2, %v634_v34, %v635_v36  ;;  %v671_v39 = vsel %vm163_vm1, %v669_v35, %v670_v61 }
 0x437   :  { %v646_v60 = vmul.f32 %v636_v38, %v2337_v25  ;;  %v682_v44 = vmul.f32 %v671_v39, %v2335_v19 }
 0x439   :  { %655 = vrot.lane.b32.xlu1 %v646_v60, %s2227_s4  ;;  %690 = vrot.lane.b32.xlu2 %v682_v44, %s2226_s3 }
 0x43b   :  { %v623_v45 = vpop.f32.mrf.mxu1 }
 0x43c   :  { %v637_v46 = vrot.slane %v623_v45, 7  ;;  %v672_v55 = vrot.slane %v623_v45, 1 }
 0x43e   :  { %v638_v50 = vsel %vm107_vm2, %v635_v36, %v637_v46  ;;  %v673_v31 = vsel %vm163_vm1, %v670_v61, %v672_v55 }
 0x43f   :  { %v647_v59 = vmul.f32 %v638_v50, %v2347_v33  ;;  %v683_v1 = vmul.f32 %v673_v31, %v2345_v30 }
 0x441   :  { %710 = vrot.lane.b32.xlu1 %v2146_v49, %s2227_s4  ;;  %657 = vrot.lane.b32.xlu2 %v647_v59, %s2227_s4 }
 0x443   :  { %v625_v32 = vpop.f32.mrf.mxu1 }
 0x444   :  { %v629_v47 = vrot.slane %v625_v32, 7  ;;  %v674_v5 = vrot.slane %v625_v32, 1 }
 0x446   :  { %v681_v9 = vsel %vm163_vm1, %v674_v5, %v669_v35  ;;  %v675_v58 = vsel %vm163_vm1, %v672_v55, %v674_v5  ;;  %v644_v37 = vsel %vm107_vm2, %v629_v47, %v634_v34  ;;  %v639_v2 = vsel %vm107_vm2, %v637_v46, %v629_v47 }
 0x447   :  { %v685_v62 = vmul.f32 %v681_v9, %v2356_v41  ;;  %v684_v63 = vmul.f32 %v675_v58, %v2358_v42  ;;  %v645_v40 = vmul.f32 %v644_v37, %v2333_v18  ;;  %v648_v3 = vmul.f32 %v639_v2, %v2372_v51  ;;  %v2148_v2 = vld [vmem:[%s3215_s8 + $0x1] ss:$0 sm:$0xff] }
 0x449   :  { %696 = vrot.lane.b32.xlu2 %v685_v62, %s2226_s3  ;;  %694 = vrot.lane.b32.xlu1 %v684_v63, %s2226_s3 }
 0x44a   :  { %653 = vrot.lane.b32.xlu0 %v645_v40, %s2227_s4 }
 0x452   :  { %692 = vrot.lane.b32.xlu0 %v683_v1, %s2226_s3 }
 0x45a   :  { %659 = vrot.lane.b32.xlu0 %v648_v3, %s2227_s4 }
 0x493   :  { %v691_v4 = vpop.permute.xlu2 %690 }
 0x49b   :  { %v658_v7 = vpop.permute.xlu2 %657 }
 0x49c   :  { %v667_v11 = vadd.f32 %v658_v7, %v623_v45  ;;  %v2147_v7 = vld [vmem:[%s3216_s7 + $0x1] ss:$0 sm:$0xff] }
 0x4a3   :  { %v697_v14 = vpop.permute.xlu2 %696 }
 0x4ab   :  { %v656_v48 = vpop.permute.xlu1 %655 }
 0x4ac   :  { %v666_v20 = vadd.f32 %v656_v48, %v620_v29 }
 0x4b3   :  { %v711_v6 = vpop.permute.xlu1 %710 }
 0x4bb   :  { %v695_v54 = vpop.permute.xlu1 %694 }
 0x4bc   :  { %v704_v12 = vadd.f32 %v695_v54, %v667_v11  ;;  %v654_v10 = vpop.permute.xlu0 %653 }
 0x4bd   :  { %v665_v13 = vadd.f32 %v654_v10, %v618_v27 }
 0x4be   :  { %v715_v15 = vadd.f32 %v711_v6, %v704_v12 }
 0x4bf   :  { %v702_v16 = vadd.f32 %v691_v4, %v665_v13 }
 0x4c0   :  { %725 = vrot.lane.b32.xlu2 %v715_v15, %s2226_s3 }
 0x4c1   :  { %v713_v17 = vadd.f32 %v711_v6, %v702_v16 }
 0x4c3   :  { %721 = vrot.lane.b32.xlu0 %v713_v17, %s2226_s3 }
 0x4c4   :  { %v693_v21 = vpop.permute.xlu0 %692 }
 0x4c5   :  { %v703_v22 = vadd.f32 %v693_v21, %v666_v20 }
 0x4c7   :  { %v714_v23 = vadd.f32 %v711_v6, %v703_v22 }
 0x4c9   :  { %723 = vrot.lane.b32.xlu1 %v714_v23, %s2226_s3 }
 0x4cc   :  { %v660_v26 = vpop.permute.xlu0 %659 }
 0x4cd   :  { %v668_v0 = vadd.f32 %v660_v26, %v625_v32 }
 0x4cf   :  { %v705_v53 = vadd.f32 %v697_v14, %v668_v0 }
 0x4d1   :  { %v716_v56 = vadd.f32 %v711_v6, %v705_v53 }
 0x4d3   :  { %727 = vrot.lane.b32.xlu0 %v716_v56, %s2226_s3 }
 0x51a   :  { %v726_v24 = vpop.permute.xlu2 %725 }
 0x51b   :  { %v739_v27 = vsel %vm75_vm0, %v726_v24, 0.0 }
 0x51c   :  { %740 = vadd.xlane.f32.xlu0 %v739_v27 }
 0x535   :  { %v722_v34 = vpop.permute.xlu0 %721 }
 0x536   :  { %v733_v29 = vsel %vm75_vm0, %v722_v34, 0.0 }
 0x537   :  { %734 = vadd.xlane.f32.xlu1 %v733_v29 }
 0x53b   :  { %v724_v35 = vpop.permute.xlu1 %723 }
 0x53c   :  { %v736_v36 = vsel %vm75_vm0, %v724_v35, 0.0 }
 0x53d   :  { %737 = vadd.xlane.f32.xlu2 %v736_v36 }
 0x545   :  { %v728_v61 = vpop.permute.xlu0 %727 }
 0x546   :  { %v742_v38 = vsel %vm75_vm0, %v728_v61, 0.0 }
 0x547   :  { %743 = vadd.xlane.f32.xlu1 %v742_v38 }
 0x58f   :  { %v741_v39 = vpop.xlane.xlu0 %740 }
 0x590   :  { %v747_v60 = vmul.f32 %v741_v39, %v2385_v28 }
 0x592   :  { %v2601_v44 = vsub.f32 %v715_v15, %v747_v60 }
 0x594   :  { %v755_v45 = vmul.f32 %v2601_v44, %v2601_v44 }
 0x596   :  { %765 = vrot.lane.b32.xlu1 %v755_v45, %s2226_s3 }
 0x5aa   :  { %v735_v46 = vpop.xlane.xlu1 %734 }
 0x5ab   :  { %v745_v49 = vmul.f32 %v735_v46, %v2385_v28 }
 0x5ad   :  { %v2607_v50 = vsub.f32 %v713_v17, %v745_v49 }
 0x5af   :  { %v753_v59 = vmul.f32 %v2607_v50, %v2607_v50 }
 0x5b0   :  { %v738_v32 = vpop.xlane.xlu2 %737 }
 0x5b1   :  { %v746_v55 = vmul.f32 %v738_v32, %v2385_v28  ;;  %761 = vrot.lane.b32.xlu2 %v753_v59, %s2226_s3 }
 0x5b3   :  { %v2613_v47 = vsub.f32 %v714_v23, %v746_v55 }
 0x5b5   :  { %v754_v5 = vmul.f32 %v2613_v47, %v2613_v47 }
 0x5b7   :  { %763 = vrot.lane.b32.xlu0 %v754_v5, %s2226_s3 }
 0x5ba   :  { %v744_v9 = vpop.xlane.xlu1 %743 }
 0x5bb   :  { %v748_v58 = vmul.f32 %v744_v9, %v2385_v28 }
 0x5bd   :  { %v2619_v37 = vsub.f32 %v716_v56, %v748_v58 }
 0x5bf   :  { %v756_v62 = vmul.f32 %v2619_v37, %v2619_v37 }
 0x5c1   :  { %767 = vrot.lane.b32.xlu0 %v756_v62, %s2226_s3 }
 0x608   :  { %v766_v63 = vpop.permute.xlu1 %765 }
 0x609   :  { %v779_v40 = vsel %vm75_vm0, %v766_v63, 0.0 }
 0x60a   :  { %780 = vadd.xlane.f32.xlu0 %v779_v40 }
 0x60b   :  { %v762_v31 = vpop.permute.xlu2 %761 }
 0x60c   :  { %v773_v1 = vsel %vm75_vm0, %v762_v31, 0.0 }
 0x60d   :  { %774 = vadd.xlane.f32.xlu2 %v773_v1 }
 0x61e   :  { %852 = vrot.lane.b32.xlu0 %v2148_v2, %s2227_s4 }
 0x629   :  { %v764_v3 = vpop.permute.xlu0 %763 }
 0x62a   :  { %v776_v48 = vsel %vm75_vm0, %v764_v3, 0.0 }
 0x62b   :  { %777 = vadd.xlane.f32.xlu1 %v776_v48 }
 0x633   :  { %v768_v4 = vpop.permute.xlu0 %767 }
 0x634   :  { %v782_v6 = vsel %vm75_vm0, %v768_v4, 0.0 }
 0x635   :  { %783 = vadd.xlane.f32.xlu2 %v782_v6 }
 0x644   :  { %841 = vrot.lane.b32.xlu1 %v2147_v7, %s2227_s4 }
 0x67d   :  { %v781_v11 = vpop.xlane.xlu0 %780 }
 0x67e   :  { %v787_v12 = vmul.f32 %v781_v11, %v2385_v28 }
 0x680   :  { %v775_v54 = vpop.xlane.xlu2 %774  ;;  %v791_v13 = vadd.f32 1e-05, %v787_v12 }
 0x681   :  { %v785_v10 = vmul.f32 %v775_v54, %v2385_v28 }
 0x682   :  { %2173 = vrsqrt.f32 %v791_v13  ;;  %vm819_vm8 = vweird.f32 %v791_v13 }
 0x683   :  { %v789_v15 = vadd.f32 1e-05, %v785_v10 }
 0x685   :  { %2175 = vrsqrt.f32 %v789_v15  ;;  %vm799_vm10 = vweird.f32 %v789_v15 }
 0x688   :  { %v2174_v16 = vpop.eup %2173 }
 0x689   :  { %v814_v20 = vmul.f32 %v2174_v16, %v791_v13  ;;  %vm820_vm6 = vweird.f32 %v2174_v16 }
 0x68a   :  { %vm821_vm9 = vmor %vm819_vm8, %vm820_vm6 }
 0x68b   :  { %v2176_v17 = vpop.eup %2175  ;;  %v815_v0 = vmul.f32 %v2174_v16, %v814_v20 }
 0x68c   :  { %v794_v21 = vmul.f32 %v2176_v17, %v789_v15  ;;  %vm800_vm7 = vweird.f32 %v2176_v17 }
 0x68d   :  { %v816_v53 = vmul.f32 0.5, %v815_v0  ;;  %vm801_vm12 = vmor %vm799_vm10, %vm800_vm7 }
 0x68e   :  { %v795_v14 = vmul.f32 %v2176_v17, %v794_v21 }
 0x68f   :  { %v817_v29 = vsub.f32 1.5, %v816_v53 }
 0x690   :  { %v796_v56 = vmul.f32 0.5, %v795_v14  ;;  %v853_v1 = vpop.permute.xlu0 %852 }
 0x691   :  { %v818_v39 = vmul.f32 %v2174_v16, %v817_v29 }
 0x692   :  { %v797_v35 = vsub.f32 1.5, %v796_v56 }
 0x693   :  { %v822_v32 = vsel %vm821_vm9, %v2174_v16, %v818_v39 }
 0x694   :  { %v798_v60 = vmul.f32 %v2176_v17, %v797_v35  ;;  %v835_v63 = vmul.f32 %v822_v32, %v2601_v44 }
 0x696   :  { %v802_v59 = vsel %vm801_vm12, %v2176_v17, %v798_v60 }
 0x697   :  { %v833_v62 = vmul.f32 %v802_v59, %v2607_v50 }
 0x69e   :  { %v778_v22 = vpop.xlane.xlu1 %777 }
 0x69f   :  { %v786_v23 = vmul.f32 %v778_v22, %v2385_v28 }
 0x6a1   :  { %v790_v26 = vadd.f32 1e-05, %v786_v23 }
 0x6a3   :  { %2177 = vrsqrt.f32 %v790_v26  ;;  %vm809_vm13 = vweird.f32 %v790_v26 }
 0x6a8   :  { %v784_v24 = vpop.xlane.xlu2 %783 }
 0x6a9   :  { %v2178_v27 = vpop.eup %2177  ;;  %v788_v34 = vmul.f32 %v784_v24, %v2385_v28 }
 0x6aa   :  { %v804_v36 = vmul.f32 %v2178_v27, %v790_v26  ;;  %vm810_vm11 = vweird.f32 %v2178_v27 }
 0x6ab   :  { %v792_v61 = vadd.f32 1e-05, %v788_v34  ;;  %vm811_vm14 = vmor %vm809_vm13, %vm810_vm11 }
 0x6ac   :  { %v805_v38 = vmul.f32 %v2178_v27, %v804_v36 }
 0x6ad   :  { %2179 = vrsqrt.f32 %v792_v61  ;;  %vm829_vm3 = vweird.f32 %v792_v61 }
 0x6ae   :  { %v806_v45 = vmul.f32 0.5, %v805_v38 }
 0x6b0   :  { %v807_v46 = vsub.f32 1.5, %v806_v45 }
 0x6b2   :  { %v808_v49 = vmul.f32 %v2178_v27, %v807_v46 }
 0x6b3   :  { %v2180_v55 = vpop.eup %2179 }
 0x6b4   :  { %v824_v5 = vmul.f32 %v2180_v55, %v792_v61  ;;  %v812_v9 = vsel %vm811_vm14, %v2178_v27, %v808_v49  ;;  %vm830_vm15 = vweird.f32 %v2180_v55 }
 0x6b5   :  { %v834_v58 = vmul.f32 %v812_v9, %v2613_v47  ;;  %vm831_vm4 = vmor %vm829_vm3, %vm830_vm15 }
 0x6b6   :  { %v825_v40 = vmul.f32 %v2180_v55, %v824_v5  ;;  %v842_v31 = vpop.permute.xlu1 %841 }
 0x6b7   :  { %v844_v2 = vmul.f32 %v842_v31, %v833_v62  ;;  %v845_v3 = vmul.f32 %v842_v31, %v834_v58  ;;  %v846_v48 = vmul.f32 %v842_v31, %v835_v63 }
 0x6b8   :  { %v826_v4 = vmul.f32 0.5, %v825_v40 }
 0x6b9   :  { %v2643_v6 = vadd.f32 %v853_v1, %v844_v2  ;;  %v2645_v7 = vadd.f32 %v853_v1, %v845_v3  ;;  %v2647_v11 = vadd.f32 %v853_v1, %v846_v48 }
 0x6ba   :  { %v827_v54 = vsub.f32 1.5, %v826_v4 }
 0x6bb   :  { %v2650_v47 = vmul.f32 0.70710677, %v2643_v6  ;;  %v2653_v44 = vmul.f32 0.70710677, %v2645_v7  ;;  %v2656_v12 = vmul.f32 0.70710677, %v2647_v11 }
 0x6bc   :  { %v828_v50 = vmul.f32 %v2180_v55, %v827_v54 }
 0x6bd   :  { %v867_v10 = vmul.f32 %v2650_v47, %v2650_v47  ;;  %v907_v15 = vmul.f32 %v2653_v44, %v2653_v44  ;;  %v947_v16 = vmul.f32 %v2656_v12, %v2656_v12 }
 0x6be   :  { %v832_v13 = vsel %vm831_vm4, %v2180_v55, %v828_v50 }
 0x6bf   :  { %v836_v17 = vmul.f32 %v832_v13, %v2619_v37  ;;  %v2665_v20 = vmin.f32 %v867_v10, 16.0  ;;  %v2667_v21 = vmin.f32 %v907_v15, 16.0  ;;  %v2669_v22 = vmin.f32 %v947_v16, 16.0 }
 0x6c1   :  { %v847_v23 = vmul.f32 %v842_v31, %v836_v17  ;;  %v869_v26 = vmul.f32 2.1237322e-06, %v2665_v20  ;;  %v880_v0 = vmul.f32 3.8918573e-05, %v2665_v20  ;;  %v909_v14 = vmul.f32 2.1237322e-06, %v2667_v21 }
 0x6c2   :  { %v949_v53 = vmul.f32 2.1237322e-06, %v2669_v22  ;;  %v960_v56 = vmul.f32 3.8918573e-05, %v2669_v22  ;;  %v920_v27 = vmul.f32 3.8918573e-05, %v2667_v21 }
 0x6c3   :  { %v2676_v24 = vadd.f32 %v853_v1, %v847_v23  ;;  %v870_v37 = vadd.f32 0.00028619796, %v869_v26  ;;  %v881_v34 = vadd.f32 0.001143296, %v880_v0  ;;  %v910_v29 = vadd.f32 0.00028619796, %v909_v14 }
 0x6c4   :  { %v950_v35 = vadd.f32 0.00028619796, %v949_v53  ;;  %v961_v36 = vadd.f32 0.001143296, %v960_v56  ;;  %v921_v39 = vadd.f32 0.001143296, %v920_v27 }
 0x6c5   :  { %v2680_v61 = vmul.f32 0.70710677, %v2676_v24  ;;  %v871_v38 = vmul.f32 %v870_v37, %v2665_v20  ;;  %v911_v60 = vmul.f32 %v910_v29, %v2667_v21  ;;  %v882_v49 = vmul.f32 %v881_v34, %v2665_v20 }
 0x6c6   :  { %v951_v45 = vmul.f32 %v950_v35, %v2669_v22  ;;  %v962_v46 = vmul.f32 %v961_v36, %v2669_v22  ;;  %v922_v55 = vmul.f32 %v921_v39, %v2667_v21 }
 0x6c7   :  { %v872_v59 = vadd.f32 0.0036580483, %v871_v38  ;;  %v987_v32 = vmul.f32 %v2680_v61, %v2680_v61  ;;  %v912_v5 = vadd.f32 0.0036580483, %v911_v60  ;;  %v883_v31 = vadd.f32 0.014752088, %v882_v49 }
 0x6c8   :  { %v952_v9 = vadd.f32 0.0036580483, %v951_v45  ;;  %v963_v58 = vadd.f32 0.014752088, %v962_v46  ;;  %v923_v40 = vadd.f32 0.014752088, %v922_v55 }
 0x6c9   :  { %v873_v62 = vmul.f32 %v872_v59, %v2665_v20  ;;  %v2691_v63 = vmin.f32 %v987_v32, 16.0  ;;  %v913_v1 = vmul.f32 %v912_v5, %v2667_v21  ;;  %v884_v50 = vmul.f32 %v883_v31, %v2665_v20 }
 0x6ca   :  { %v953_v2 = vmul.f32 %v952_v9, %v2669_v22  ;;  %v964_v3 = vmul.f32 %v963_v58, %v2669_v22  ;;  %v924_v54 = vmul.f32 %v923_v40, %v2667_v21 }
 0x6cb   :  { %v874_v48 = vadd.f32 0.05243302, %v873_v62  ;;  %v989_v4 = vmul.f32 2.1237322e-06, %v2691_v63  ;;  %v914_v10 = vadd.f32 0.05243302, %v913_v1 }
 0x6cc   :  { %v954_v13 = vadd.f32 0.05243302, %v953_v2  ;;  %v965_v15 = vadd.f32 0.112945676, %v964_v3  ;;  %v925_v23 = vadd.f32 0.112945676, %v924_v54 }
 0x6cd   :  { %v875_v16 = vmul.f32 %v874_v48, %v2665_v20  ;;  %v990_v17 = vadd.f32 0.00028619796, %v989_v4  ;;  %v885_v26 = vadd.f32 0.112945676, %v884_v50  ;;  %v915_v0 = vmul.f32 %v914_v10, %v2667_v21 }
 0x6ce   :  { %v955_v14 = vmul.f32 %v954_v13, %v2669_v22  ;;  %v966_v53 = vmul.f32 %v965_v15, %v2669_v22  ;;  %v926_v56 = vmul.f32 %v925_v23, %v2667_v21  ;;  %v1000_v27 = vmul.f32 3.8918573e-05, %v2691_v63 }
 0x6cf   :  { %v886_v37 = vmul.f32 %v885_v26, %v2665_v20  ;;  %v876_v34 = vadd.f32 0.18741608, %v875_v16  ;;  %v991_v35 = vmul.f32 %v990_v17, %v2691_v63  ;;  %v916_v39 = vadd.f32 0.18741608, %v915_v0 }
 0x6d0   :  { %v967_v29 = vadd.f32 0.4994258, %v966_v53  ;;  %v927_v36 = vadd.f32 0.4994258, %v926_v56  ;;  %v956_v60 = vadd.f32 0.18741608, %v955_v14 }
 0x6d1   :  { %v887_v38 = vadd.f32 0.4994258, %v886_v37  ;;  %v1001_v59 = vadd.f32 0.001143296, %v1000_v27  ;;  %v877_v32 = vmul.f32 %v876_v34, %v2665_v20  ;;  %v992_v5 = vadd.f32 0.0036580483, %v991_v35 }
 0x6d2   :  { %v968_v45 = vmul.f32 %v967_v29, %v2669_v22  ;;  %v928_v46 = vmul.f32 %v927_v36, %v2667_v21  ;;  %v917_v62 = vmul.f32 %v916_v39, %v2667_v21  ;;  %v957_v40 = vmul.f32 %v956_v60, %v2669_v22 }
 0x6d3   :  { %v888_v49 = vmul.f32 %v887_v38, %v2665_v20  ;;  %v1002_v31 = vmul.f32 %v1001_v59, %v2691_v63  ;;  %v878_v1 = vadd.f32 1.1283791, %v877_v32  ;;  %v993_v2 = vmul.f32 %v992_v5, %v2691_v63 }
 0x6d4   :  { %v969_v55 = vadd.f32 1.0, %v968_v45  ;;  %v929_v9 = vadd.f32 1.0, %v928_v46  ;;  %v918_v3 = vadd.f32 1.1283791, %v917_v62  ;;  %v958_v20 = vadd.f32 1.1283791, %v957_v40 }
 0x6d5   :  { %v2711_v58 = vadd.f32 1.0, %v888_v49  ;;  %v1003_v48 = vadd.f32 0.014752088, %v1002_v31  ;;  %v879_v54 = vmul.f32 %v878_v1, %v2650_v47  ;;  %v994_v10 = vadd.f32 0.05243302, %v993_v2 }
 0x6d6   :  { %2181 = vrcp.f32 %v969_v55  ;;  %v979_v13 = vand.u32 2147483647, %v969_v55  ;;  %v919_v16 = vmul.f32 %v918_v3, %v2653_v44  ;;  %v959_v17 = vmul.f32 %v958_v20, %v2656_v12 }
 0x6d7   :  { %2183 = vrcp.f32 %v929_v9  ;;  %v1004_v22 = vmul.f32 %v1003_v48, %v2691_v63  ;;  %vm975_vm5 = vweird.f32 %v969_v55  ;;  %v981_v0 = vand.u32 2147483648, %v969_v55 }
 0x6d8   :  { %2185 = vrcp.f32 %v2711_v58  ;;  %vm935_vm6 = vweird.f32 %v929_v9  ;;  %v939_v47 = vand.u32 2147483647, %v929_v9  ;;  %v941_v56 = vand.u32 2147483648, %v929_v9 }
 0x6d9   :  { %v1005_v37 = vadd.f32 0.112945676, %v1004_v22  ;;  %vm2723_vm8 = vcmp.eq.f32.partialorder %v979_v13, 8.507059e+37  ;;  %v901_v12 = vand.u32 2147483648, %v2711_v58  ;;  %v899_v39 = vand.u32 2147483647, %v2711_v58 }
 0x6da   :  { %v982_v60 = vor.u32 1.1754944e-38, %v981_v0  ;;  %vm895_vm12 = vweird.f32 %v2711_v58  ;;  %vm940_vm14 = vcmp.eq.f32.partialorder %v939_v47, 8.507059e+37  ;;  %v942_v59 = vor.u32 1.1754944e-38, %v941_v56 }
 0x6db   :  { %v1006_v35 = vmul.f32 %v1005_v37, %v2691_v63  ;;  %v902_v40 = vor.u32 1.1754944e-38, %v901_v12  ;;  %vm900_vm3 = vcmp.eq.f32.partialorder %v899_v39, 8.507059e+37  ;;  %v861_v13 = vmul.f32 0.5, %v2647_v11 }
 0x6dc   :  { %v2182_v4 = vpop.eup %2181 }
 0x6dd   :  { %v2184_v50 = vpop.eup %2183  ;;  %v971_v21 = vmul.f32 %v2182_v4, %v969_v55  ;;  %vm976_vm7 = vweird.f32 %v2182_v4  ;;  %v1007_v46 = vadd.f32 0.4994258, %v1006_v35 }
 0x6de   :  { %v2186_v15 = vpop.eup %2185  ;;  %v931_v23 = vmul.f32 %v2184_v50, %v929_v9  ;;  %vm936_vm9 = vweird.f32 %v2184_v50  ;;  %vm977_vm11 = vmor %vm975_vm5, %vm976_vm7  ;;  %v995_v9 = vmul.f32 %v994_v10, %v2691_v63 }
 0x6df   :  { %v972_v26 = vsub.f32 1.0, %v971_v21  ;;  %v891_v14 = vmul.f32 %v2186_v15, %v2711_v58  ;;  %vm896_vm10 = vweird.f32 %v2186_v15  ;;  %vm937_vm13 = vmor %vm935_vm6, %vm936_vm9  ;;  %v1008_v55 = vmul.f32 %v1007_v46, %v2691_v63 }
 0x6e0   :  { %v932_v53 = vsub.f32 1.0, %v931_v23  ;;  %vm897_vm15 = vmor %vm895_vm12, %vm896_vm10  ;;  %v860_v23 = vmul.f32 0.5, %v2645_v7 }
 0x6e1   :  { %v973_v27 = vmul.f32 %v2182_v4, %v972_v26  ;;  %v892_v44 = vsub.f32 1.0, %v891_v14  ;;  %v1009_v20 = vadd.f32 1.0, %v1008_v55 }
 0x6e2   :  { %v933_v29 = vmul.f32 %v2184_v50, %v932_v53 }
 0x6e3   :  { %v974_v36 = vadd.f32 %v2182_v4, %v973_v27  ;;  %v893_v38 = vmul.f32 %v2186_v15, %v892_v44  ;;  %2187 = vrcp.f32 %v1009_v20  ;;  %v1021_v37 = vand.u32 2147483648, %v1009_v20 }
 0x6e4   :  { %v934_v45 = vadd.f32 %v2184_v50, %v933_v29  ;;  %v1019_v44 = vand.u32 2147483647, %v1009_v20  ;;  %vm1015_vm5 = vweird.f32 %v1009_v20 }
 0x6e5   :  { %v978_v49 = vsel %vm977_vm11, %v2182_v4, %v974_v36  ;;  %v894_v32 = vadd.f32 %v2186_v15, %v893_v38  ;;  %v1022_v12 = vor.u32 1.1754944e-38, %v1021_v37 }
 0x6e6   :  { %v983_v5 = vsel %vm2723_vm8, %v982_v60, %v978_v49  ;;  %v938_v62 = vsel %vm937_vm13, %v2184_v50, %v934_v45  ;;  %vm1020_vm7 = vcmp.eq.f32.partialorder %v1019_v44, 8.507059e+37  ;;  %v862_v60 = vmul.f32 0.5, %v2676_v24  ;;  %v2221_v24 = vld [vmem:[%s3212_s0] sm:$0xff] }
 0x6e7   :  { %v984_v31 = vmul.f32 %v983_v5, %v959_v17  ;;  %v943_v1 = vsel %vm940_vm14, %v942_v59, %v938_v62  ;;  %v898_v2 = vsel %vm897_vm15, %v2186_v15, %v894_v32  ;;  %v859_v17 = vmul.f32 0.5, %v2643_v6  ;;  %v2133_v59 = vld [vmem:[%s3210_s5 + $0x28] sm:$0xff] }
 0x6e8   :  { %v944_v58 = vmul.f32 %v943_v1, %v919_v16  ;;  %v903_v3 = vsel %vm900_vm3, %v902_v40, %v898_v2  ;;  %v996_v15 = vadd.f32 0.18741608, %v995_v9  ;;  %1090 = vmatpush.bf16.msra.mxu2 %v2133_v59  ;;  %v2222_v40 = vld [vmem:[%s3212_s0 + $0x8] sm:$0xff] }
 0x6e9   :  { %v2079_v48 = vclamps-f32 %v984_v31, 1.0  ;;  %v904_v4 = vmul.f32 %v903_v3, %v879_v54  ;;  %v2188_v47 = vpop.eup %2187 }
 0x6ea   :  { %v2078_v21 = vclamps-f32 %v944_v58, 1.0  ;;  %v997_v56 = vmul.f32 %v996_v15, %v2691_v63  ;;  %v1011_v7 = vmul.f32 %v2188_v47, %v1009_v20  ;;  %vm1016_vm4 = vweird.f32 %v2188_v47  ;;  %v2223_v58 = vld [vmem:[%s3212_s0 + $0x10] sm:$0xff]  ;;  %v2224_v20 = vld [vmem:[%s3212_s0 + $0x18] sm:$0xff] }
 0x6eb   :  { %v1029_v50 = vadd.f32 1.0, %v2079_v48  ;;  %v2077_v22 = vclamps-f32 %v904_v4, 1.0  ;;  %vm1017_vm6 = vmor %vm1015_vm5, %vm1016_vm4 }
 0x6ec   :  { %v1028_v26 = vadd.f32 1.0, %v2078_v21  ;;  %v1012_v6 = vsub.f32 1.0, %v1011_v7  ;;  %v998_v27 = vadd.f32 1.1283791, %v997_v56 }
 0x6ed   :  { %v1033_v0 = vmul.f32 %v1029_v50, %v861_v13  ;;  %v1027_v16 = vadd.f32 1.0, %v2077_v22 }
 0x6ee   :  { %v1032_v14 = vmul.f32 %v1028_v26, %v860_v23  ;;  %v1013_v34 = vmul.f32 %v2188_v47, %v1012_v6  ;;  %v999_v63 = vmul.f32 %v998_v27, %v2680_v61  ;;  %v2132_v61 = vld [vmem:[%s3210_s5 + $0x20] sm:$0xff] }
 0x6ef   :  { %v1037_v53 = vmul.f32 %v1033_v0, %v2552_v8  ;;  %v1031_v10 = vmul.f32 %v1027_v16, %v859_v17  ;;  %1091 = vmatpush.bf16.msra.mxu2 %v2132_v61 }
 0x6f0   :  { %v1036_v54 = vmul.f32 %v1032_v14, %v2540_v57  ;;  %v1014_v29 = vadd.f32 %v2188_v47, %v1013_v34 }
 0x6f1   :  { %1047 = vrot.lane.b32.xlu1 %v1037_v53, %s2226_s3  ;;  %v1035_v11 = vmul.f32 %v1031_v10, %v2542_v52  ;;  %v2149_v53 = vld [vmem:[%s3214_s6 + $0x2] ss:$0 sm:$0xff] }
 0x6f2   :  { %1045 = vrot.lane.b32.xlu0 %v1036_v54, %s2226_s3  ;;  %v1018_v35 = vsel %vm1017_vm6, %v2188_v47, %v1014_v29 }
 0x6f3   :  { %1043 = vrot.lane.b32.xlu2 %v1035_v11, %s2226_s3  ;;  %v1023_v36 = vsel %vm1020_vm7, %v1022_v12, %v1018_v35 }
 0x6f4   :  { %v1024_v38 = vmul.f32 %v1023_v36, %v999_v63 }
 0x6f6   :  { %v2080_v39 = vclamps-f32 %v1024_v38, 1.0 }
 0x6f8   :  { %v1030_v45 = vadd.f32 1.0, %v2080_v39 }
 0x6fa   :  { %v1034_v46 = vmul.f32 %v1030_v45, %v862_v60 }
 0x6fc   :  { %v1038_v49 = vmul.f32 %v1034_v46, %v2554_v43 }
 0x6fe   :  { %1049 = vrot.lane.b32.xlu2 %v1038_v49, %s2226_s3 }
 0x74d   :  { %v1044_v32 = vpop.permute.xlu2 %1043 }
 0x74e   :  { %v2760_v62 = vadd.f32 %v2221_v24, %v1044_v32 }
 0x758   :  { %v1050_v2 = vpop.permute.xlu2 %1049 }
 0x759   :  { %v2778_v9 = vadd.f32 %v2224_v20, %v1050_v2 }
 0x763   :  { %v1048_v1 = vpop.permute.xlu1 %1047 }
 0x764   :  { %v1046_v5 = vpop.permute.xlu0 %1045  ;;  %v2773_v3 = vadd.f32 %v2223_v58, %v1048_v1 }
 0x765   :  { %v2765_v55 = vadd.f32 %v2222_v40, %v1046_v5 }
 0x766   :  { %v1060_v48 = vpack.c.bf16 %v2778_v9, %v2773_v3 }
 0x767   :  { %v1059_v31 = vpack.c.bf16 %v2765_v55, %v2760_v62 }
 0x769   :  { %2093 = vmatmul.msk.bf16.vlgmr.msra.gmra.mxu2 %vm75_vm0, %v1059_v31 }
 0x779   :  { %2094 = vmatmul.msk.bf16.gmra.mxu2 %vm75_vm0, %v1060_v48 }
 0x7ec   :  { %v1093_v4 = vpop.f32.mrf.mxu2 }
 0x7ed   :  { %v1109_v13 = vrot.slane %v1093_v4, 7  ;;  %v1144_v50 = vrot.slane %v1093_v4, 1 }
 0x7f4   :  { %v1095_v21 = vpop.f32.mrf.mxu2 }
 0x7f5   :  { %v1110_v22 = vrot.slane %v1095_v21, 7  ;;  %v1145_v23 = vrot.slane %v1095_v21, 1 }
 0x7f7   :  { %v1146_v26 = vsel %vm163_vm1, %v1144_v50, %v1145_v23  ;;  %v1111_v17 = vsel %vm107_vm2, %v1109_v13, %v1110_v22 }
 0x7f8   :  { %v1157_v15 = vmul.f32 %v1146_v26, %v2335_v19  ;;  %v1121_v0 = vmul.f32 %v1111_v17, %v2337_v25 }
 0x7fa   :  { %1165 = vrot.lane.b32.xlu2 %v1157_v15, %s2226_s3  ;;  %1130 = vrot.lane.b32.xlu1 %v1121_v0, %s2227_s4 }
 0x7fc   :  { %v1098_v16 = vpop.f32.mrf.mxu2 }
 0x7fd   :  { %v1112_v14 = vrot.slane %v1098_v16, 7  ;;  %v1147_v56 = vrot.slane %v1098_v16, 1 }
 0x7ff   :  { %v1113_v10 = vsel %vm107_vm2, %v1110_v22, %v1112_v14  ;;  %v1148_v12 = vsel %vm163_vm1, %v1145_v23, %v1147_v56 }
 0x800   :  { %v1122_v47 = vmul.f32 %v1113_v10, %v2347_v33  ;;  %v1158_v63 = vmul.f32 %v1148_v12, %v2345_v30 }
 0x802   :  { %1185 = vrot.lane.b32.xlu1 %v2149_v53, %s2227_s4  ;;  %1132 = vrot.lane.b32.xlu2 %v1122_v47, %s2227_s4 }
 0x804   :  { %v1100_v54 = vpop.f32.mrf.mxu2 }
 0x805   :  { %v1104_v11 = vrot.slane %v1100_v54, 7  ;;  %v1149_v7 = vrot.slane %v1100_v54, 1 }
 0x807   :  { %v1156_v6 = vsel %vm163_vm1, %v1149_v7, %v1144_v50  ;;  %v1150_v37 = vsel %vm163_vm1, %v1147_v56, %v1149_v7  ;;  %v1119_v27 = vsel %vm107_vm2, %v1104_v11, %v1109_v13  ;;  %v1114_v35 = vsel %vm107_vm2, %v1112_v14, %v1104_v11 }
 0x808   :  { %v1160_v34 = vmul.f32 %v1156_v6, %v2356_v41  ;;  %v1159_v44 = vmul.f32 %v1150_v37, %v2358_v42  ;;  %v1120_v29 = vmul.f32 %v1119_v27, %v2333_v18  ;;  %v1123_v36 = vmul.f32 %v1114_v35, %v2372_v51 }
 0x80a   :  { %1171 = vrot.lane.b32.xlu2 %v1160_v34, %s2226_s3  ;;  %1169 = vrot.lane.b32.xlu1 %v1159_v44, %s2226_s3 }
 0x80b   :  { %1128 = vrot.lane.b32.xlu0 %v1120_v29, %s2227_s4 }
 0x813   :  { %1167 = vrot.lane.b32.xlu0 %v1158_v63, %s2226_s3 }
 0x81b   :  { %1134 = vrot.lane.b32.xlu0 %v1123_v36, %s2227_s4 }
 0x854   :  { %v1166_v39 = vpop.permute.xlu2 %1165 }
 0x85c   :  { %v1133_v45 = vpop.permute.xlu2 %1132 }
 0x85d   :  { %v1142_v46 = vadd.f32 %v1133_v45, %v1098_v16 }
 0x864   :  { %v1172_v13 = vpop.permute.xlu2 %1171 }
 0x86c   :  { %v1131_v38 = vpop.permute.xlu1 %1130 }
 0x86d   :  { %v1141_v31 = vadd.f32 %v1131_v38, %v1095_v21  ;;  %v2150_v38 = vld [vmem:[%s3215_s8 + $0x2] ss:$0 sm:$0xff] }
 0x874   :  { %v1186_v60 = vpop.permute.xlu1 %1185 }
 0x87c   :  { %v1170_v49 = vpop.permute.xlu1 %1169 }
 0x87d   :  { %v1179_v59 = vadd.f32 %v1170_v49, %v1142_v46  ;;  %v1129_v61 = vpop.permute.xlu0 %1128 }
 0x87e   :  { %v1140_v32 = vadd.f32 %v1129_v61, %v1093_v4  ;;  %v2151_v61 = vld [vmem:[%s3216_s7 + $0x2] ss:$0 sm:$0xff] }
 0x87f   :  { %v1190_v5 = vadd.f32 %v1186_v60, %v1179_v59 }
 0x880   :  { %v1177_v24 = vadd.f32 %v1166_v39, %v1140_v32 }
 0x881   :  { %1200 = vrot.lane.b32.xlu2 %v1190_v5, %s2226_s3 }
 0x882   :  { %v1188_v40 = vadd.f32 %v1186_v60, %v1177_v24 }
 0x884   :  { %1196 = vrot.lane.b32.xlu0 %v1188_v40, %s2226_s3 }
 0x885   :  { %v1168_v1 = vpop.permute.xlu0 %1167 }
 0x886   :  { %v1178_v2 = vadd.f32 %v1168_v1, %v1141_v31 }
 0x888   :  { %v1189_v58 = vadd.f32 %v1186_v60, %v1178_v2 }
 0x88a   :  { %1198 = vrot.lane.b32.xlu1 %v1189_v58, %s2226_s3 }
 0x88d   :  { %v1135_v20 = vpop.permute.xlu0 %1134 }
 0x88e   :  { %v1143_v48 = vadd.f32 %v1135_v20, %v1100_v54 }
 0x890   :  { %v1180_v50 = vadd.f32 %v1172_v13, %v1143_v48 }
 0x892   :  { %v1191_v22 = vadd.f32 %v1186_v60, %v1180_v50 }
 0x894   :  { %1202 = vrot.lane.b32.xlu0 %v1191_v22, %s2226_s3 }
 0x8db   :  { %v1201_v4 = vpop.permute.xlu2 %1200 }
 0x8dc   :  { %v1214_v23 = vsel %vm75_vm0, %v1201_v4, 0.0 }
 0x8dd   :  { %1215 = vadd.xlane.f32.xlu0 %v1214_v23 }
 0x8f6   :  { %v1197_v26 = vpop.permute.xlu0 %1196 }
 0x8f7   :  { %v1208_v21 = vsel %vm75_vm0, %v1197_v26, 0.0 }
 0x8f8   :  { %1209 = vadd.xlane.f32.xlu1 %v1208_v21 }
 0x8fc   :  { %v1199_v17 = vpop.permute.xlu1 %1198 }
 0x8fd   :  { %v1211_v15 = vsel %vm75_vm0, %v1199_v17, 0.0 }
 0x8fe   :  { %1212 = vadd.xlane.f32.xlu2 %v1211_v15 }
 0x906   :  { %v1203_v0 = vpop.permute.xlu0 %1202 }
 0x907   :  { %v1217_v16 = vsel %vm75_vm0, %v1203_v0, 0.0 }
 0x908   :  { %1218 = vadd.xlane.f32.xlu2 %v1217_v16 }
 0x950   :  { %v1216_v14 = vpop.xlane.xlu0 %1215 }
 0x951   :  { %v1222_v53 = vmul.f32 %v1216_v14, %v2385_v28 }
 0x953   :  { %v1226_v10 = vsub.f32 %v1190_v5, %v1222_v53 }
 0x955   :  { %v1230_v47 = vmul.f32 %v1226_v10, %v1226_v10 }
 0x957   :  { %1240 = vrot.lane.b32.xlu2 %v1230_v47, %s2226_s3 }
 0x96b   :  { %v1210_v54 = vpop.xlane.xlu1 %1209 }
 0x96c   :  { %v1220_v56 = vmul.f32 %v1210_v54, %v2385_v28 }
 0x96e   :  { %v2822_v11 = vsub.f32 %v1188_v40, %v1220_v56 }
 0x970   :  { %v1228_v7 = vmul.f32 %v2822_v11, %v2822_v11 }
 0x971   :  { %v1213_v6 = vpop.xlane.xlu2 %1212 }
 0x972   :  { %v1221_v37 = vmul.f32 %v1213_v6, %v2385_v28  ;;  %1236 = vrot.lane.b32.xlu1 %v1228_v7, %s2226_s3 }
 0x974   :  { %v2828_v27 = vsub.f32 %v1189_v58, %v1221_v37 }
 0x976   :  { %v1229_v34 = vmul.f32 %v2828_v27, %v2828_v27 }
 0x978   :  { %1238 = vrot.lane.b32.xlu0 %v1229_v34, %s2226_s3 }
 0x97b   :  { %v1219_v44 = vpop.xlane.xlu2 %1218 }
 0x97c   :  { %v1223_v29 = vmul.f32 %v1219_v44, %v2385_v28 }
 0x97e   :  { %v2834_v12 = vsub.f32 %v1191_v22, %v1223_v29 }
 0x980   :  { %v1231_v63 = vmul.f32 %v2834_v12, %v2834_v12 }
 0x982   :  { %1242 = vrot.lane.b32.xlu0 %v1231_v63, %s2226_s3 }
 0x9b1   :  { %v1241_v35 = vpop.permute.xlu2 %1240 }
 0x9b2   :  { %v1254_v36 = vsel %vm75_vm0, %v1241_v35, 0.0 }
 0x9b3   :  { %1255 = vadd.xlane.f32.xlu0 %v1254_v36 }
 0x9c7   :  { %1327 = vrot.lane.b32.xlu0 %v2150_v38, %s2227_s4 }
 0x9e4   :  { %v1237_v39 = vpop.permute.xlu1 %1236 }
 0x9e5   :  { %v1248_v60 = vsel %vm75_vm0, %v1237_v39, 0.0 }
 0x9e6   :  { %1249 = vadd.xlane.f32.xlu1 %v1248_v60 }
 0x9ea   :  { %v1239_v45 = vpop.permute.xlu0 %1238 }
 0x9eb   :  { %v1251_v46 = vsel %vm75_vm0, %v1239_v45, 0.0 }
 0x9ec   :  { %1252 = vadd.xlane.f32.xlu2 %v1251_v46 }
 0x9f4   :  { %v1243_v49 = vpop.permute.xlu0 %1242 }
 0x9f5   :  { %v1257_v59 = vsel %vm75_vm0, %v1243_v49, 0.0 }
 0x9f6   :  { %1258 = vadd.xlane.f32.xlu1 %v1257_v59 }
 0xa04   :  { %1316 = vrot.lane.b32.xlu2 %v2151_v61, %s2227_s4 }
 0xa26   :  { %v1256_v32 = vpop.xlane.xlu0 %1255 }
 0xa27   :  { %v1262_v5 = vmul.f32 %v1256_v32, %v2385_v28 }
 0xa29   :  { %v1266_v24 = vadd.f32 1e-05, %v1262_v5 }
 0xa2b   :  { %2189 = vrsqrt.f32 %v1266_v24  ;;  %vm1294_vm9 = vweird.f32 %v1266_v24 }
 0xa31   :  { %v2190_v40 = vpop.eup %2189 }
 0xa32   :  { %v1289_v31 = vmul.f32 %v2190_v40, %v1266_v24  ;;  %vm1295_vm8 = vweird.f32 %v2190_v40 }
 0xa33   :  { %vm1296_vm10 = vmor %vm1294_vm9, %vm1295_vm8 }
 0xa34   :  { %v1290_v1 = vmul.f32 %v2190_v40, %v1289_v31 }
 0xa36   :  { %v1291_v2 = vmul.f32 0.5, %v1290_v1 }
 0xa38   :  { %v1292_v48 = vsub.f32 1.5, %v1291_v2 }
 0xa39   :  { %v2856_v14 = vpop.permute.xlu0 %1327 }
 0xa3a   :  { %v1293_v50 = vmul.f32 %v2190_v40, %v1292_v48 }
 0xa3c   :  { %v1297_v26 = vsel %vm1296_vm10, %v2190_v40, %v1293_v50 }
 0xa3d   :  { %v1310_v15 = vmul.f32 %v1297_v26, %v1226_v10 }
 0xa59   :  { %v1250_v58 = vpop.xlane.xlu1 %1249 }
 0xa5a   :  { %v1260_v20 = vmul.f32 %v1250_v58, %v2385_v28 }
 0xa5c   :  { %v1264_v13 = vadd.f32 1e-05, %v1260_v20 }
 0xa5e   :  { %2191 = vrsqrt.f32 %v1264_v13  ;;  %vm1274_vm12 = vweird.f32 %v1264_v13 }
 0xa5f   :  { %v1253_v22 = vpop.xlane.xlu2 %1252 }
 0xa60   :  { %v1261_v4 = vmul.f32 %v1253_v22, %v2385_v28 }
 0xa62   :  { %v1265_v23 = vadd.f32 1e-05, %v1261_v4 }
 0xa64   :  { %v2192_v21 = vpop.eup %2191  ;;  %2193 = vrsqrt.f32 %v1265_v23  ;;  %vm1284_vm15 = vweird.f32 %v1265_v23 }
 0xa65   :  { %v1269_v17 = vmul.f32 %v2192_v21, %v1264_v13  ;;  %vm1275_vm11 = vweird.f32 %v2192_v21 }
 0xa66   :  { %vm1276_vm13 = vmor %vm1274_vm12, %vm1275_vm11 }
 0xa67   :  { %v1270_v0 = vmul.f32 %v2192_v21, %v1269_v17  ;;  %v2854_v16 = vpop.permute.xlu2 %1316 }
 0xa68   :  { %v1321_v53 = vmul.f32 %v2854_v16, %v1310_v15 }
 0xa69   :  { %v1271_v47 = vmul.f32 0.5, %v1270_v0  ;;  %v1259_v54 = vpop.xlane.xlu1 %1258 }
 0xa6a   :  { %v2194_v56 = vpop.eup %2193  ;;  %v1263_v7 = vmul.f32 %v1259_v54, %v2385_v28  ;;  %v2861_v6 = vadd.f32 %v2856_v14, %v1321_v53 }
 0xa6b   :  { %v1272_v37 = vsub.f32 1.5, %v1271_v47  ;;  %v1279_v34 = vmul.f32 %v2194_v56, %v1265_v23  ;;  %vm1285_vm14 = vweird.f32 %v2194_v56 }
 0xa6c   :  { %v1267_v44 = vadd.f32 1e-05, %v1263_v7  ;;  %v2864_v10 = vmul.f32 0.70710677, %v2861_v6  ;;  %vm1286_vm3 = vmor %vm1284_vm15, %vm1285_vm14 }
 0xa6d   :  { %v1273_v29 = vmul.f32 %v2192_v21, %v1272_v37  ;;  %v1280_v63 = vmul.f32 %v2194_v56, %v1279_v34 }
 0xa6e   :  { %2195 = vrsqrt.f32 %v1267_v44  ;;  %v1422_v35 = vmul.f32 %v2864_v10, %v2864_v10  ;;  %vm1304_vm5 = vweird.f32 %v1267_v44 }
 0xa6f   :  { %v1281_v36 = vmul.f32 0.5, %v1280_v63  ;;  %v1277_v38 = vsel %vm1276_vm13, %v2192_v21, %v1273_v29 }
 0xa70   :  { %v1308_v39 = vmul.f32 %v1277_v38, %v2822_v11  ;;  %v2869_v60 = vmin.f32 %v1422_v35, 16.0 }
 0xa71   :  { %v1282_v45 = vsub.f32 1.5, %v1281_v36 }
 0xa72   :  { %v1319_v46 = vmul.f32 %v2854_v16, %v1308_v39  ;;  %v1435_v49 = vmul.f32 3.8918573e-05, %v2869_v60  ;;  %v1424_v17 = vmul.f32 2.1237322e-06, %v2869_v60 }
 0xa73   :  { %v1283_v59 = vmul.f32 %v2194_v56, %v1282_v45 }
 0xa74   :  { %v2196_v61 = vpop.eup %2195  ;;  %v2874_v32 = vadd.f32 %v2856_v14, %v1319_v46  ;;  %v1436_v5 = vadd.f32 0.001143296, %v1435_v49  ;;  %v1425_v29 = vadd.f32 0.00028619796, %v1424_v17 }
 0xa75   :  { %v1287_v24 = vsel %vm1286_vm3, %v2194_v56, %v1283_v59  ;;  %v1299_v40 = vmul.f32 %v2196_v61, %v1267_v44  ;;  %vm1305_vm4 = vweird.f32 %v2196_v61 }
 0xa76   :  { %v1309_v11 = vmul.f32 %v1287_v24, %v2828_v27  ;;  %v2878_v31 = vmul.f32 0.70710677, %v2874_v32  ;;  %v1437_v2 = vmul.f32 %v1436_v5, %v2869_v60  ;;  %vm1306_vm6 = vmor %vm1304_vm5, %vm1305_vm4  ;;  %v1426_v5 = vmul.f32 %v1425_v29, %v2869_v60 }
 0xa77   :  { %v1300_v1 = vmul.f32 %v2196_v61, %v1299_v40 }
 0xa78   :  { %v1320_v58 = vmul.f32 %v2854_v16, %v1309_v11  ;;  %v1342_v20 = vmul.f32 %v2878_v31, %v2878_v31  ;;  %v1438_v13 = vadd.f32 0.014752088, %v1437_v2 }
 0xa79   :  { %v1301_v48 = vmul.f32 0.5, %v1300_v1 }
 0xa7a   :  { %v2885_v50 = vadd.f32 %v2856_v14, %v1320_v58  ;;  %v2887_v22 = vmin.f32 %v1342_v20, 16.0  ;;  %v1439_v27 = vmul.f32 %v1438_v13, %v2869_v60  ;;  %v1427_v20 = vadd.f32 0.0036580483, %v1426_v5 }
 0xa7b   :  { %v1302_v4 = vsub.f32 1.5, %v1301_v48 }
 0xa7c   :  { %v2891_v23 = vmul.f32 0.70710677, %v2885_v50  ;;  %v1344_v26 = vmul.f32 2.1237322e-06, %v2887_v22  ;;  %v1355_v15 = vmul.f32 3.8918573e-05, %v2887_v22 }
 0xa7d   :  { %v1303_v21 = vmul.f32 %v2196_v61, %v1302_v4  ;;  %v1440_v0 = vadd.f32 0.112945676, %v1439_v27 }
 0xa7e   :  { %v1345_v53 = vadd.f32 0.00028619796, %v1344_v26  ;;  %v1382_v47 = vmul.f32 %v2891_v23, %v2891_v23  ;;  %v1356_v56 = vadd.f32 0.001143296, %v1355_v15 }
 0xa7f   :  { %v1307_v54 = vsel %vm1306_vm6, %v2196_v61, %v1303_v21  ;;  %v1441_v7 = vmul.f32 %v1440_v0, %v2869_v60 }
 0xa80   :  { %v1311_v37 = vmul.f32 %v1307_v54, %v2834_v12  ;;  %v1346_v34 = vmul.f32 %v1345_v53, %v2887_v22  ;;  %v2901_v44 = vmin.f32 %v1382_v47, 16.0  ;;  %v1357_v63 = vmul.f32 %v1356_v56, %v2887_v22 }
 0xa81   :  { %v1442_v35 = vadd.f32 0.4994258, %v1441_v7  ;;  %v1428_v53 = vmul.f32 %v1427_v20, %v2869_v60 }
 0xa82   :  { %v1322_v36 = vmul.f32 %v2854_v16, %v1311_v37  ;;  %v1347_v38 = vadd.f32 0.0036580483, %v1346_v34  ;;  %v1384_v39 = vmul.f32 2.1237322e-06, %v2901_v44  ;;  %v1395_v45 = vmul.f32 3.8918573e-05, %v2901_v44 }
 0xa83   :  { %v1358_v46 = vadd.f32 0.014752088, %v1357_v63  ;;  %v1443_v61 = vmul.f32 %v1442_v35, %v2869_v60  ;;  %v1429_v35 = vadd.f32 0.05243302, %v1428_v53 }
 0xa84   :  { %v2908_v49 = vadd.f32 %v2856_v14, %v1322_v36  ;;  %v1385_v12 = vadd.f32 0.00028619796, %v1384_v39  ;;  %v1396_v59 = vadd.f32 0.001143296, %v1395_v45  ;;  %v1348_v16 = vmul.f32 %v1347_v38, %v2887_v22 }
 0xa85   :  { %v1359_v24 = vmul.f32 %v1358_v46, %v2887_v22  ;;  %v2921_v58 = vadd.f32 1.0, %v1443_v61  ;;  %v1430_v61 = vmul.f32 %v1429_v35, %v2869_v60 }
 0xa86   :  { %v2914_v40 = vmul.f32 0.70710677, %v2908_v49  ;;  %v1386_v11 = vmul.f32 %v1385_v12, %v2901_v44  ;;  %v1397_v2 = vmul.f32 %v1396_v59, %v2901_v44  ;;  %v1349_v4 = vadd.f32 0.05243302, %v1348_v16 }
 0xa87   :  { %v1360_v1 = vadd.f32 0.112945676, %v1359_v24  ;;  %2197 = vrcp.f32 %v2921_v58  ;;  %vm1450_vm13 = vweird.f32 %v2921_v58 }
 0xa88   :  { %v1462_v14 = vmul.f32 %v2914_v40, %v2914_v40  ;;  %v1398_v13 = vadd.f32 0.014752088, %v1397_v2  ;;  %v1387_v26 = vadd.f32 0.0036580483, %v1386_v11  ;;  %v1350_v56 = vmul.f32 %v1349_v4, %v2887_v22 }
 0xa89   :  { %v1361_v48 = vmul.f32 %v1360_v1, %v2887_v22 }
 0xa8a   :  { %v2924_v27 = vmin.f32 %v1462_v14, 16.0  ;;  %v1399_v17 = vmul.f32 %v1398_v13, %v2901_v44  ;;  %v1388_v37 = vmul.f32 %v1387_v26, %v2901_v44  ;;  %v1351_v45 = vadd.f32 0.18741608, %v1350_v56 }
 0xa8b   :  { %v1362_v21 = vadd.f32 0.4994258, %v1361_v48  ;;  %v1431_v13 = vadd.f32 0.18741608, %v1430_v61 }
 0xa8c   :  { %v1464_v15 = vmul.f32 2.1237322e-06, %v2924_v27  ;;  %v1475_v0 = vmul.f32 3.8918573e-05, %v2924_v27  ;;  %v1400_v54 = vadd.f32 0.112945676, %v1399_v17  ;;  %v1352_v2 = vmul.f32 %v1351_v45, %v2887_v22 }
 0xa8d   :  { %v1363_v47 = vmul.f32 %v1362_v21, %v2887_v22  ;;  %v2935_v36 = vpop.eup %2197  ;;  %v1389_v46 = vadd.f32 0.05243302, %v1388_v37  ;;  %v1432_v56 = vmul.f32 %v1431_v13, %v2869_v60  ;;  %v1454_v13 = vand.u32 2147483647, %v2921_v58 }
 0xa8e   :  { %v1465_v7 = vadd.f32 0.00028619796, %v1464_v15  ;;  %v1401_v29 = vmul.f32 %v1400_v54, %v2901_v44  ;;  %v1476_v63 = vadd.f32 0.001143296, %v1475_v0  ;;  %v1446_v5 = vmul.f32 %v2935_v36, %v2921_v58 }
 0xa8f   :  { %v1364_v34 = vadd.f32 1.0, %v1363_v47  ;;  %v1390_v14 = vmul.f32 %v1389_v46, %v2901_v44  ;;  %v1353_v15 = vadd.f32 1.1283791, %v1352_v2  ;;  %v1456_v46 = vand.u32 2147483648, %v2921_v58 }
 0xa90   :  { %v1466_v38 = vmul.f32 %v1465_v7, %v2924_v27  ;;  %v1402_v39 = vadd.f32 0.4994258, %v1401_v29  ;;  %v1477_v12 = vmul.f32 %v1476_v63, %v2924_v27  ;;  %v1447_v4 = vsub.f32 1.0, %v1446_v5 }
 0xa91   :  { %2199 = vrcp.f32 %v1364_v34  ;;  %v1391_v0 = vadd.f32 0.18741608, %v1390_v14  ;;  %v1376_v53 = vand.u32 2147483648, %v1364_v34  ;;  %v1374_v54 = vand.u32 2147483647, %v1364_v34 }
 0xa92   :  { %v1403_v59 = vmul.f32 %v1402_v39, %v2901_v44  ;;  %v1478_v24 = vadd.f32 0.014752088, %v1477_v12  ;;  %v1467_v16 = vadd.f32 0.0036580483, %v1466_v38  ;;  %v1448_v7 = vmul.f32 %v2935_v36, %v1447_v4 }
 0xa93   :  { %vm1370_vm8 = vweird.f32 %v1364_v34  ;;  %v1392_v38 = vmul.f32 %v1391_v0, %v2901_v44  ;;  %v1377_v39 = vor.u32 1.1754944e-38, %v1376_v53  ;;  %v1354_v12 = vmul.f32 %v1353_v15, %v2878_v31  ;;  %v2135_v44 = vld [vmem:[%s3210_s5 + $0x38] sm:$0xff] }
 0xa94   :  { %v2943_v11 = vadd.f32 1.0, %v1403_v59  ;;  %v1479_v20 = vmul.f32 %v1478_v24, %v2924_v27  ;;  %v1468_v26 = vmul.f32 %v1467_v16, %v2924_v27  ;;  %vm1375_vm10 = vcmp.eq.f32.partialorder %v1374_v54, 8.507059e+37  ;;  %1551 = vmatpush.bf16.msra.mxu3 %v2135_v44 }
 0xa95   :  { %v1449_v24 = vadd.f32 %v2935_v36, %v1448_v7  ;;  %vm1451_vm11 = vweird.f32 %v2935_v36  ;;  %v1457_v54 = vor.u32 1.1754944e-38, %v1456_v46  ;;  %vm1455_vm5 = vcmp.eq.f32.partialorder %v1454_v13, 8.507059e+37 }
 0xa96   :  { %2201 = vrcp.f32 %v2943_v11  ;;  %v1480_v17 = vadd.f32 0.112945676, %v1479_v20  ;;  %v1469_v29 = vadd.f32 0.05243302, %v1468_v26  ;;  %v1416_v2 = vand.u32 2147483648, %v2943_v11  ;;  %vm2974_vm15 = vmor %vm1450_vm13, %vm1451_vm11 }
 0xa97   :  { %v2200_v1 = vpop.eup %2199  ;;  %v1414_v20 = vand.u32 2147483647, %v2943_v11  ;;  %vm1410_vm14 = vweird.f32 %v2943_v11  ;;  %v1453_v53 = vsel %vm2974_vm15, %v2935_v36, %v1449_v24 }
 0xa98   :  { %v1366_v48 = vmul.f32 %v2200_v1, %v1364_v34  ;;  %vm1371_vm7 = vweird.f32 %v2200_v1  ;;  %v1481_v22 = vmul.f32 %v1480_v17, %v2924_v27  ;;  %v1470_v34 = vmul.f32 %v1469_v29, %v2924_v27 }
 0xa99   :  { %vm1372_vm9 = vmor %vm1370_vm8, %vm1371_vm7  ;;  %v1433_v17 = vadd.f32 1.1283791, %v1432_v56  ;;  %v1417_v0 = vor.u32 1.1754944e-38, %v1416_v2  ;;  %vm1415_vm4 = vcmp.eq.f32.partialorder %v1414_v20, 8.507059e+37  ;;  %v1458_v29 = vsel %vm1455_vm5, %v1457_v54, %v1453_v53 }
 0xa9a   :  { %v1367_v21 = vsub.f32 1.0, %v1366_v48  ;;  %v1482_v35 = vadd.f32 0.4994258, %v1481_v22  ;;  %v2134_v48 = vld [vmem:[%s3210_s5 + $0x30] sm:$0xff]  ;;  %v1471_v15 = vadd.f32 0.18741608, %v1470_v34 }
 0xa9b   :  { %1552 = vmatpush.bf16.msra.mxu3 %v2134_v48  ;;  %v1434_v56 = vmul.f32 %v1433_v17, %v2864_v10  ;;  %v1336_v48 = vmul.f32 0.5, %v2861_v6 }
 0xa9c   :  { %v1368_v47 = vmul.f32 %v2200_v1, %v1367_v21  ;;  %v2202_v37 = vpop.eup %2201  ;;  %v1483_v60 = vmul.f32 %v1482_v35, %v2924_v27  ;;  %v1472_v35 = vmul.f32 %v1471_v15, %v2924_v27 }
 0xa9d   :  { %v1406_v45 = vmul.f32 %v2202_v37, %v2943_v11  ;;  %vm1411_vm12 = vweird.f32 %v2202_v37 }
 0xa9e   :  { %v1369_v63 = vadd.f32 %v2200_v1, %v1368_v47  ;;  %v1484_v31 = vadd.f32 1.0, %v1483_v60  ;;  %vm1412_vm3 = vmor %vm1410_vm14, %vm1411_vm12 }
 0xa9f   :  { %v1407_v5 = vsub.f32 1.0, %v1406_v45  ;;  %v1459_v45 = vmul.f32 %v1458_v29, %v1434_v56 }
 0xaa0   :  { %v1373_v59 = vsel %vm1372_vm9, %v2200_v1, %v1369_v63  ;;  %v1393_v1 = vadd.f32 1.1283791, %v1392_v38  ;;  %2203 = vrcp.f32 %v1484_v31  ;;  %v1334_v38 = vmul.f32 0.5, %v2874_v32 }
 0xaa1   :  { %v1378_v61 = vsel %vm1375_vm10, %v1377_v39, %v1373_v59  ;;  %v1408_v14 = vmul.f32 %v2202_v37, %v1407_v5  ;;  %v1473_v59 = vadd.f32 1.1283791, %v1472_v35  ;;  %v1496_v60 = vand.u32 2147483648, %v1484_v31 }
 0xaa2   :  { %v1379_v16 = vmul.f32 %v1378_v61, %v1354_v12  ;;  %v1394_v58 = vmul.f32 %v1393_v1, %v2891_v23  ;;  %v1335_v23 = vmul.f32 0.5, %v2885_v50  ;;  %v1494_v24 = vand.u32 2147483647, %v1484_v31 }
 0xaa3   :  { %v1409_v26 = vadd.f32 %v2202_v37, %v1408_v14  ;;  %v2100_v44 = vclamps-f32 %v1459_v45, 1.0  ;;  %vm1490_vm7 = vweird.f32 %v1484_v31  ;;  %v1497_v34 = vor.u32 1.1754944e-38, %v1496_v60 }
 0xaa4   :  { %v2098_v4 = vclamps-f32 %v1379_v16, 1.0  ;;  %v1474_v50 = vmul.f32 %v1473_v59, %v2914_v40  ;;  %vm1495_vm9 = vcmp.eq.f32.partialorder %v1494_v24, 8.507059e+37 }
 0xaa5   :  { %v1413_v47 = vsel %vm1412_vm3, %v2202_v37, %v1409_v26  ;;  %v1504_v20 = vadd.f32 1.0, %v2100_v44 }
 0xaa6   :  { %v1418_v11 = vsel %vm1415_vm4, %v1417_v0, %v1413_v47  ;;  %v1502_v7 = vadd.f32 1.0, %v2098_v4  ;;  %v2204_v63 = vpop.eup %2203  ;;  %v1337_v4 = vmul.f32 0.5, %v2908_v49 }
 0xaa7   :  { %v1419_v22 = vmul.f32 %v1418_v11, %v1394_v58  ;;  %v1486_v36 = vmul.f32 %v2204_v63, %v1484_v31  ;;  %vm1491_vm6 = vweird.f32 %v2204_v63  ;;  %v1508_v21 = vmul.f32 %v1504_v20, %v1336_v48 }
 0xaa8   :  { %v1506_v46 = vmul.f32 %v1502_v7, %v1334_v38  ;;  %vm1492_vm8 = vmor %vm1490_vm7, %vm1491_vm6 }
 0xaa9   :  { %v2099_v39 = vclamps-f32 %v1419_v22, 1.0  ;;  %v1487_v12 = vsub.f32 1.0, %v1486_v36  ;;  %v1512_v17 = vmul.f32 %v1508_v21, %v2552_v8 }
 0xaaa   :  { %v1510_v10 = vmul.f32 %v1506_v46, %v2542_v52 }
 0xaab   :  { %v1503_v37 = vadd.f32 1.0, %v2099_v39  ;;  %v1488_v5 = vmul.f32 %v2204_v63, %v1487_v12 }
 0xaad   :  { %v1507_v61 = vmul.f32 %v1503_v37, %v1335_v23  ;;  %v1489_v32 = vadd.f32 %v2204_v63, %v1488_v5 }
 0xaaf   :  { %v1511_v27 = vmul.f32 %v1507_v61, %v2540_v57  ;;  %v1493_v2 = vsel %vm1492_vm8, %v2204_v63, %v1489_v32 }
 0xab0   :  { %v1498_v1 = vsel %vm1495_vm9, %v1497_v34, %v1493_v2 }
 0xab1   :  { %v1514_v16 = vpack.c.bf16 %v1511_v27, %v1510_v10  ;;  %v1499_v14 = vmul.f32 %v1498_v1, %v1474_v50 }
 0xab3   :  { %1523 = vrot.lane.b32.xlu1 %v1514_v16, %s2226_s3  ;;  %v2101_v13 = vclamps-f32 %v1499_v14, 1.0 }
 0xab5   :  { %v1505_v26 = vadd.f32 1.0, %v2101_v13 }
 0xab7   :  { %v1509_v31 = vmul.f32 %v1505_v26, %v1337_v4 }
 0xab9   :  { %v1513_v40 = vmul.f32 %v1509_v31, %v2554_v43 }
 0xabb   :  { %v1515_v15 = vpack.c.bf16 %v1513_v40, %v1512_v17 }
 0xabd   :  { %1525 = vrot.lane.b32.xlu0 %v1515_v15, %s2226_s3 }
 0xb25   :  { %v1524_v0 = vpop.permute.xlu1 %1523 }
 0xb26   :  { %2114 = vmatmul.msk.bf16.vlgmr.msra.gmra.mxu3 %vm75_vm0, %v1524_v0 }
 0xb2f   :  { %v1526_v53 = vpop.permute.xlu0 %1525 }
 0xb36   :  { %2115 = vmatmul.msk.bf16.gmra.mxu3 %vm75_vm0, %v1526_v53 }
 0xba9   :  { %v1554_v6 = vpop.f32.mrf.mxu3 }
 0xbaa   :  { %v1570_v7 = vrot.slane %v1554_v6, 7  ;;  %v1605_v63 = vrot.slane %v1554_v6, 1 }
 0xbb1   :  { %v1556_v58 = vpop.f32.mrf.mxu3 }
 0xbb2   :  { %v1571_v49 = vrot.slane %v1556_v58, 7 }
 0xbb4   :  { %v1572_v38 = vsel %vm107_vm2, %v1570_v7, %v1571_v49 }
 0xbb5   :  { %v1582_v45 = vmul.f32 %v1572_v38, %v2337_v25  ;;  %v2152_v25 = vld [vmem:[%s3214_s6 + $0x3] ss:$0 sm:$0xff] }
 0xbb9   :  { %v1559_v47 = vpop.f32.mrf.mxu3 }
 0xbba   :  { %v1573_v54 = vrot.slane %v1559_v47, 7  ;;  %v1608_v46 = vrot.slane %v1559_v47, 1 }
 0xbbc   :  { %v1574_v11 = vsel %vm107_vm2, %v1571_v49, %v1573_v54 }
 0xbbd   :  { %v1583_v22 = vmul.f32 %v1574_v11, %v2347_v33  ;;  %v1606_v33 = vrot.slane %v1556_v58, 1 }
 0xbbf   :  { %1593 = vrot.lane.b32.xlu0 %v1583_v22, %s2227_s4  ;;  %v1607_v12 = vsel %vm163_vm1, %v1605_v63, %v1606_v33  ;;  %v1609_v61 = vsel %vm163_vm1, %v1606_v33, %v1608_v46 }
 0xbc0   :  { %v1619_v24 = vmul.f32 %v1609_v61, %v2345_v30  ;;  %v2153_v61 = vld [vmem:[%s3216_s7 + $0x3] ss:$0 sm:$0xff] }
 0xbc1   :  { %v1561_v29 = vpop.f32.mrf.mxu3 }
 0xbc2   :  { %v1565_v56 = vrot.slane %v1561_v29, 7  ;;  %v1610_v35 = vrot.slane %v1561_v29, 1 }
 0xbc4   :  { %v1617_v39 = vsel %vm163_vm1, %v1610_v35, %v1605_v63  ;;  %v1575_v36 = vsel %vm107_vm2, %v1573_v54, %v1565_v56  ;;  %v1611_v59 = vsel %vm163_vm1, %v1608_v46, %v1610_v35  ;;  %v1580_v60 = vsel %vm107_vm2, %v1565_v56, %v1570_v7 }
 0xbc5   :  { %v1621_v23 = vmul.f32 %v1617_v39, %v2356_v41  ;;  %v1584_v37 = vmul.f32 %v1575_v36, %v2372_v51  ;;  %v1618_v41 = vmul.f32 %v1607_v12, %v2335_v19  ;;  %v1620_v51 = vmul.f32 %v1611_v59, %v2358_v42 }
 0xbc6   :  { %v1581_v5 = vmul.f32 %v1580_v60, %v2333_v18 }
 0xbc7   :  { %1591 = vrot.lane.b32.xlu0 %v1582_v45, %s2227_s4  ;;  %1632 = vrot.lane.b32.xlu1 %v1621_v23, %s2226_s3 }
 0xbc8   :  { %1595 = vrot.lane.b32.xlu2 %v1584_v37, %s2227_s4 }
 0xbcf   :  { %1626 = vrot.lane.b32.xlu0 %v1618_v41, %s2226_s3  ;;  %1630 = vrot.lane.b32.xlu1 %v1620_v51, %s2226_s3 }
 0xbd0   :  { %1646 = vrot.lane.b32.xlu2 %v2152_v25, %s2227_s4 }
 0xbd7   :  { %1589 = vrot.lane.b32.xlu1 %v1581_v5, %s2227_s4 }
 0xbd8   :  { %1628 = vrot.lane.b32.xlu2 %v1619_v24, %s2226_s3  ;;  %v2154_v24 = vld [vmem:[%s3215_s8 + $0x3] ss:$0 sm:$0xff] }
 0xc22   :  { %v1596_v19 = vpop.permute.xlu2 %1595 }
 0xc23   :  { %v1604_v10 = vadd.f32 %v1596_v19, %v1561_v29 }
 0xc2a   :  { %v1647_v42 = vpop.permute.xlu2 %1646 }
 0xc31   :  { %v1594_v44 = vpop.permute.xlu0 %1593 }
 0xc32   :  { %v1629_v16 = vpop.permute.xlu2 %1628  ;;  %v1603_v14 = vadd.f32 %v1594_v44, %v1559_v47 }
 0xc39   :  { %v1592_v27 = vpop.permute.xlu0 %1591  ;;  %v1633_v32 = vpop.permute.xlu1 %1632 }
 0xc3a   :  { %v1602_v34 = vadd.f32 %v1592_v27, %v1556_v58  ;;  %v1641_v50 = vadd.f32 %v1633_v32, %v1604_v10 }
 0xc3c   :  { %v1639_v2 = vadd.f32 %v1629_v16, %v1602_v34  ;;  %v1652_v1 = vadd.f32 %v1647_v42, %v1641_v50 }
 0xc3e   :  { %1663 = vrot.lane.b32.xlu2 %v1652_v1, %s2226_s3  ;;  %v1650_v18 = vadd.f32 %v1647_v42, %v1639_v2 }
 0xc40   :  { %1659 = vrot.lane.b32.xlu0 %v1650_v18, %s2226_s3 }
 0xc41   :  { %v1631_v30 = vpop.permute.xlu1 %1630  ;;  %v1627_v26 = vpop.permute.xlu0 %1626 }
 0xc42   :  { %v1640_v20 = vadd.f32 %v1631_v30, %v1603_v14 }
 0xc44   :  { %v1651_v48 = vadd.f32 %v1647_v42, %v1640_v20 }
 0xc46   :  { %1661 = vrot.lane.b32.xlu1 %v1651_v48, %s2226_s3 }
 0xc49   :  { %v1590_v13 = vpop.permute.xlu1 %1589 }
 0xc4a   :  { %v1601_v4 = vadd.f32 %v1590_v13, %v1554_v6 }
 0xc4c   :  { %v1638_v21 = vadd.f32 %v1627_v26, %v1601_v4 }
 0xc4e   :  { %v1649_v31 = vadd.f32 %v1647_v42, %v1638_v21 }
 0xc50   :  { %1657 = vrot.lane.b32.xlu2 %v1649_v31, %s2226_s3 }
 0xc98   :  { %v1664_v17 = vpop.permute.xlu2 %1663 }
 0xc99   :  { %v1678_v40 = vsel %vm75_vm0, %v1664_v17, 0.0 }
 0xc9a   :  { %1679 = vadd.xlane.f32.xlu1 %v1678_v40 }
 0xcaa   :  { %v1658_v15 = vpop.permute.xlu2 %1657 }
 0xcab   :  { %v1669_v0 = vsel %vm75_vm0, %v1658_v15, 0.0 }
 0xcac   :  { %1670 = vadd.xlane.f32.xlu1 %v1669_v0 }
 0xcb2   :  { %v1660_v53 = vpop.permute.xlu0 %1659 }
 0xcb3   :  { %v1672_v58 = vsel %vm75_vm0, %v1660_v53, 0.0 }
 0xcb4   :  { %1673 = vadd.xlane.f32.xlu2 %v1672_v58 }
 0xcb8   :  { %v1662_v47 = vpop.permute.xlu1 %1661 }
 0xcb9   :  { %v1675_v6 = vsel %vm75_vm0, %v1662_v47, 0.0 }
 0xcba   :  { %1676 = vadd.xlane.f32.xlu0 %v1675_v6 }
 0xd0d   :  { %v1680_v49 = vpop.xlane.xlu1 %1679 }
 0xd0e   :  { %v1684_v54 = vmul.f32 %v1680_v49, %v2385_v28 }
 0xd10   :  { %v3034_v11 = vsub.f32 %v1652_v1, %v1684_v54 }
 0xd12   :  { %v1692_v22 = vmul.f32 %v3034_v11, %v3034_v11 }
 0xd14   :  { %1703 = vrot.lane.b32.xlu0 %v1692_v22, %s2226_s3 }
 0xd1f   :  { %v1671_v7 = vpop.xlane.xlu1 %1670 }
 0xd20   :  { %v1681_v29 = vmul.f32 %v1671_v7, %v2385_v28 }
 0xd22   :  { %v3040_v63 = vsub.f32 %v1649_v31, %v1681_v29 }
 0xd24   :  { %v1689_v56 = vmul.f32 %v3040_v63, %v3040_v63 }
 0xd26   :  { %1697 = vrot.lane.b32.xlu0 %v1689_v56, %s2226_s3 }
 0xd27   :  { %v1674_v35 = vpop.xlane.xlu2 %1673 }
 0xd28   :  { %v1682_v38 = vmul.f32 %v1674_v35, %v2385_v28 }
 0xd2a   :  { %v3046_v39 = vsub.f32 %v1650_v18, %v1682_v38 }
 0xd2c   :  { %v1690_v36 = vmul.f32 %v3046_v39, %v3046_v39 }
 0xd2d   :  { %v1677_v45 = vpop.xlane.xlu0 %1676 }
 0xd2e   :  { %v1683_v23 = vmul.f32 %v1677_v45, %v2385_v28  ;;  %1699 = vrot.lane.b32.xlu1 %v1690_v36, %s2226_s3 }
 0xd30   :  { %v3052_v37 = vsub.f32 %v1651_v48, %v1683_v23 }
 0xd32   :  { %v1691_v33 = vmul.f32 %v3052_v37, %v3052_v37 }
 0xd34   :  { %1701 = vrot.lane.b32.xlu2 %v1691_v33, %s2226_s3 }
 0xd86   :  { %v1704_v46 = vpop.permute.xlu0 %1703 }
 0xd87   :  { %v1718_v12 = vsel %vm75_vm0, %v1704_v46, 0.0 }
 0xd88   :  { %1719 = vadd.xlane.f32.xlu2 %v1718_v12 }
 0xd8e   :  { %v1702_v59 = vpop.permute.xlu2 %1701 }
 0xd8f   :  { %v1715_v25 = vsel %vm75_vm0, %v1702_v59, 0.0 }
 0xd90   :  { %1716 = vadd.xlane.f32.xlu0 %v1715_v25 }
 0xd98   :  { %v1698_v41 = vpop.permute.xlu0 %1697 }
 0xd99   :  { %v1709_v51 = vsel %vm75_vm0, %v1698_v41, 0.0 }
 0xd9a   :  { %1710 = vadd.xlane.f32.xlu2 %v1709_v51 }
 0xda0   :  { %v1700_v60 = vpop.permute.xlu1 %1699 }
 0xda1   :  { %v1712_v5 = vsel %vm75_vm0, %v1700_v60, 0.0 }
 0xda2   :  { %1713 = vadd.xlane.f32.xlu1 %v1712_v5 }
 0xda4   :  { %1777 = vrot.lane.b32.xlu0 %v2153_v61, %s2227_s4 }
 0xdbb   :  { %1788 = vrot.lane.b32.xlu1 %v2154_v24, %s2227_s4 }
 0xdfb   :  { %v1720_v19 = vpop.xlane.xlu2 %1719 }
 0xdfc   :  { %v1724_v42 = vmul.f32 %v1720_v19, %v2385_v28 }
 0xdfe   :  { %v1728_v27 = vadd.f32 1e-05, %v1724_v42 }
 0xe00   :  { %vm1765_vm15 = vweird.f32 %v1728_v27 }
 0xe03   :  { %v1717_v44 = vpop.xlane.xlu0 %1716 }
 0xe04   :  { %v1723_v10 = vmul.f32 %v1717_v44, %v2385_v28 }
 0xe06   :  { %v1727_v32 = vadd.f32 1e-05, %v1723_v10 }
 0xe08   :  { %2205 = vrsqrt.f32 %v1727_v32  ;;  %vm1755_vm10 = vweird.f32 %v1727_v32 }
 0xe09   :  { %2207 = vrsqrt.f32 %v1728_v27 }
 0xe0d   :  { %v1711_v34 = vpop.xlane.xlu2 %1710 }
 0xe0e   :  { %v2206_v50 = vpop.eup %2205  ;;  %v1721_v16 = vmul.f32 %v1711_v34, %v2385_v28 }
 0xe0f   :  { %v2208_v2 = vpop.eup %2207  ;;  %v1750_v18 = vmul.f32 %v2206_v50, %v1727_v32  ;;  %vm1756_vm1 = vweird.f32 %v2206_v50 }
 0xe10   :  { %v1725_v1 = vadd.f32 1e-05, %v1721_v16  ;;  %v1760_v14 = vmul.f32 %v2208_v2, %v1728_v27  ;;  %vm1766_vm11 = vweird.f32 %v2208_v2  ;;  %vm1757_vm12 = vmor %vm1755_vm10, %vm1756_vm1 }
 0xe11   :  { %v1751_v30 = vmul.f32 %v2206_v50, %v1750_v18  ;;  %vm1767_vm3 = vmor %vm1765_vm15, %vm1766_vm11 }
 0xe12   :  { %2209 = vrsqrt.f32 %v1725_v1  ;;  %v1761_v13 = vmul.f32 %v2208_v2, %v1760_v14  ;;  %vm1735_vm13 = vweird.f32 %v1725_v1 }
 0xe13   :  { %v1752_v21 = vmul.f32 0.5, %v1751_v30 }
 0xe14   :  { %v1762_v17 = vmul.f32 0.5, %v1761_v13 }
 0xe15   :  { %v1714_v20 = vpop.xlane.xlu1 %1713  ;;  %v1753_v15 = vsub.f32 1.5, %v1752_v21 }
 0xe16   :  { %v1722_v48 = vmul.f32 %v1714_v20, %v2385_v28  ;;  %v1763_v53 = vsub.f32 1.5, %v1762_v17  ;;  %v1778_v33 = vpop.permute.xlu0 %1777 }
 0xe17   :  { %v1754_v6 = vmul.f32 %v2206_v50, %v1753_v15 }
 0xe18   :  { %v2210_v4 = vpop.eup %2209  ;;  %v1726_v26 = vadd.f32 1e-05, %v1722_v48  ;;  %v1764_v28 = vmul.f32 %v2208_v2, %v1763_v53 }
 0xe19   :  { %v1730_v31 = vmul.f32 %v2210_v4, %v1725_v1  ;;  %vm1736_vm2 = vweird.f32 %v2210_v4  ;;  %v1758_v29 = vsel %vm1757_vm12, %v2206_v50, %v1754_v6 }
 0xe1a   :  { %2211 = vrsqrt.f32 %v1726_v26  ;;  %vm1737_vm14 = vmor %vm1735_vm13, %vm1736_vm2  ;;  %v1768_v38 = vsel %vm1767_vm3, %v2208_v2, %v1764_v28  ;;  %v1771_v36 = vmul.f32 %v1758_v29, %v3052_v37  ;;  %vm1745_vm5 = vweird.f32 %v1726_v26 }
 0xe1b   :  { %v1731_v40 = vmul.f32 %v2210_v4, %v1730_v31  ;;  %v1772_v46 = vmul.f32 %v1768_v38, %v3034_v11 }
 0xe1c   :  { %v1782_v41 = vmul.f32 %v1778_v33, %v1771_v36 }
 0xe1d   :  { %v1732_v0 = vmul.f32 0.5, %v1731_v40  ;;  %v1783_v51 = vmul.f32 %v1778_v33, %v1772_v46 }
 0xe1f   :  { %v1733_v58 = vsub.f32 1.5, %v1732_v0 }
 0xe20   :  { %v2212_v47 = vpop.eup %2211 }
 0xe21   :  { %v1734_v49 = vmul.f32 %v2210_v4, %v1733_v58  ;;  %v1740_v54 = vmul.f32 %v2212_v47, %v1726_v26  ;;  %vm1746_vm4 = vweird.f32 %v2212_v47 }
 0xe22   :  { %vm1747_vm6 = vmor %vm1745_vm5, %vm1746_vm4 }
 0xe23   :  { %v1741_v22 = vmul.f32 %v2212_v47, %v1740_v54  ;;  %v1738_v56 = vsel %vm1737_vm14, %v2210_v4, %v1734_v49 }
 0xe24   :  { %v1769_v45 = vmul.f32 %v1738_v56, %v3040_v63 }
 0xe25   :  { %v1742_v7 = vmul.f32 0.5, %v1741_v22 }
 0xe26   :  { %v1780_v25 = vmul.f32 %v1778_v33, %v1769_v45 }
 0xe27   :  { %v1743_v35 = vsub.f32 1.5, %v1742_v7 }
 0xe29   :  { %v1744_v23 = vmul.f32 %v2212_v47, %v1743_v35 }
 0xe2b   :  { %v1748_v12 = vsel %vm1747_vm6, %v2212_v47, %v1744_v23 }
 0xe2c   :  { %v1770_v59 = vmul.f32 %v1748_v12, %v3046_v39 }
 0xe2d   :  { %v1789_v60 = vpop.permute.xlu1 %1788 }
 0xe2e   :  { %v1781_v61 = vmul.f32 %v1778_v33, %v1770_v59  ;;  %v3077_v5 = vadd.f32 %v1789_v60, %v1780_v25  ;;  %v3079_v24 = vadd.f32 %v1789_v60, %v1782_v41  ;;  %v3081_v37 = vadd.f32 %v1789_v60, %v1783_v51 }
 0xe30   :  { %v3083_v63 = vadd.f32 %v1789_v60, %v1781_v61  ;;  %v3086_v19 = vmul.f32 0.70710677, %v3077_v5  ;;  %v3089_v11 = vmul.f32 0.70710677, %v3079_v24  ;;  %v3092_v39 = vmul.f32 0.70710677, %v3081_v37 }
 0xe32   :  { %v3095_v42 = vmul.f32 0.70710677, %v3083_v63  ;;  %v1803_v44 = vmul.f32 %v3086_v19, %v3086_v19  ;;  %v1883_v10 = vmul.f32 %v3089_v11, %v3089_v11  ;;  %v1923_v27 = vmul.f32 %v3092_v39, %v3092_v39 }
 0xe34   :  { %v1843_v32 = vmul.f32 %v3095_v42, %v3095_v42  ;;  %v3105_v34 = vmin.f32 %v1803_v44, 16.0  ;;  %v3107_v50 = vmin.f32 %v1883_v10, 16.0  ;;  %v3109_v16 = vmin.f32 %v1923_v27, 16.0 }
 0xe36   :  { %v3111_v2 = vmin.f32 %v1843_v32, 16.0  ;;  %v1805_v1 = vmul.f32 2.1237322e-06, %v3105_v34  ;;  %v1885_v18 = vmul.f32 2.1237322e-06, %v3107_v50 }
 0xe37   :  { %v1925_v14 = vmul.f32 2.1237322e-06, %v3109_v16  ;;  %v1896_v20 = vmul.f32 3.8918573e-05, %v3107_v50  ;;  %v1936_v48 = vmul.f32 3.8918573e-05, %v3109_v16 }
 0xe38   :  { %v1845_v30 = vmul.f32 2.1237322e-06, %v3111_v2  ;;  %v1806_v13 = vadd.f32 0.00028619796, %v1805_v1  ;;  %v1886_v4 = vadd.f32 0.00028619796, %v1885_v18 }
 0xe39   :  { %v1926_v26 = vadd.f32 0.00028619796, %v1925_v14  ;;  %v1897_v31 = vadd.f32 0.001143296, %v1896_v20  ;;  %v1937_v17 = vadd.f32 0.001143296, %v1936_v48 }
 0xe3a   :  { %v1846_v21 = vadd.f32 0.00028619796, %v1845_v30  ;;  %v1807_v40 = vmul.f32 %v1806_v13, %v3105_v34  ;;  %v1887_v15 = vmul.f32 %v1886_v4, %v3107_v50  ;;  %v1816_v53 = vmul.f32 3.8918573e-05, %v3105_v34 }
 0xe3b   :  { %v1927_v0 = vmul.f32 %v1926_v26, %v3109_v16  ;;  %v1898_v58 = vmul.f32 %v1897_v31, %v3107_v50  ;;  %v1938_v47 = vmul.f32 %v1937_v17, %v3109_v16  ;;  %v1856_v6 = vmul.f32 3.8918573e-05, %v3111_v2 }
 0xe3c   :  { %v1847_v49 = vmul.f32 %v1846_v21, %v3111_v2  ;;  %v1888_v54 = vadd.f32 0.0036580483, %v1887_v15  ;;  %v1808_v29 = vadd.f32 0.0036580483, %v1807_v40  ;;  %v1817_v35 = vadd.f32 0.001143296, %v1816_v53 }
 0xe3d   :  { %v1928_v28 = vadd.f32 0.0036580483, %v1927_v0  ;;  %v1899_v22 = vadd.f32 0.014752088, %v1898_v58  ;;  %v1939_v7 = vadd.f32 0.014752088, %v1938_v47 }
 0xe3e   :  { %v1889_v56 = vmul.f32 %v1888_v54, %v3107_v50  ;;  %v1857_v23 = vadd.f32 0.001143296, %v1856_v6  ;;  %v1848_v33 = vadd.f32 0.0036580483, %v1847_v49  ;;  %v1818_v46 = vmul.f32 %v1817_v35, %v3105_v34 }
 0xe3f   :  { %v1929_v38 = vmul.f32 %v1928_v28, %v3109_v16  ;;  %v1900_v36 = vmul.f32 %v1899_v22, %v3107_v50  ;;  %v1940_v45 = vmul.f32 %v1939_v7, %v3109_v16  ;;  %v1809_v41 = vmul.f32 %v1808_v29, %v3105_v34 }
 0xe40   :  { %v1858_v25 = vmul.f32 %v1857_v23, %v3111_v2  ;;  %v1890_v51 = vadd.f32 0.05243302, %v1889_v56  ;;  %v1819_v60 = vadd.f32 0.014752088, %v1818_v46  ;;  %v1849_v32 = vmul.f32 %v1848_v33, %v3111_v2 }
 0xe41   :  { %v1901_v12 = vadd.f32 0.112945676, %v1900_v36  ;;  %v1941_v59 = vadd.f32 0.112945676, %v1940_v45  ;;  %v1930_v61 = vadd.f32 0.05243302, %v1929_v38  ;;  %v16_v29 = vstv %s3218_s10 }
 0xe42   :  { %v1859_v27 = vadd.f32 0.014752088, %v1858_v25  ;;  %v1820_v1 = vmul.f32 %v1819_v60, %v3105_v34  ;;  %v1810_v20 = vadd.f32 0.05243302, %v1809_v41  ;;  %v1891_v48 = vmul.f32 %v1890_v51, %v3107_v50  ;;  %17 = vst [vmem:[#allocation2] sm:$0x1] %v16_v29 }
 0xe43   :  { %v1902_v44 = vmul.f32 %v1901_v12, %v3107_v50  ;;  %v1942_v10 = vmul.f32 %v1941_v59, %v3109_v16  ;;  %v1931_v4 = vmul.f32 %v1930_v61, %v3109_v16  ;;  %v1850_v17 = vadd.f32 0.05243302, %v1849_v32 }
 0xe44   :  { %v1860_v30 = vmul.f32 %v1859_v27, %v3111_v2  ;;  %v1821_v13 = vadd.f32 0.112945676, %v1820_v1  ;;  %v1811_v58 = vmul.f32 %v1810_v20, %v3105_v34  ;;  %v1892_v6 = vadd.f32 0.18741608, %v1891_v48 }
 0xe45   :  { %v1903_v18 = vadd.f32 0.4994258, %v1902_v44  ;;  %v1943_v14 = vadd.f32 0.4994258, %v1942_v10  ;;  %v1932_v49 = vadd.f32 0.18741608, %v1931_v4  ;;  %v1851_v54 = vmul.f32 %v1850_v17, %v3111_v2 }
 0xe46   :  { %v1861_v31 = vadd.f32 0.112945676, %v1860_v30  ;;  %v1822_v40 = vmul.f32 %v1821_v13, %v3105_v34  ;;  %v1812_v7 = vadd.f32 0.18741608, %v1811_v58  ;;  %v1893_v56 = vmul.f32 %v1892_v6, %v3107_v50 }
 0xe47   :  { %v1904_v26 = vmul.f32 %v1903_v18, %v3107_v50  ;;  %v1944_v21 = vmul.f32 %v1943_v14, %v3109_v16  ;;  %v1933_v35 = vmul.f32 %v1932_v49, %v3109_v16  ;;  %v1852_v45 = vadd.f32 0.18741608, %v1851_v54 }
 0xe48   :  { %v1862_v53 = vmul.f32 %v1861_v31, %v3111_v2  ;;  %v1823_v47 = vadd.f32 0.4994258, %v1822_v40  ;;  %v1813_v46 = vmul.f32 %v1812_v7, %v3105_v34  ;;  %v3161_v25 = vmul.f32 0.5, %v3079_v24 }
 0xe49   :  { %v1905_v15 = vadd.f32 1.0, %v1904_v26  ;;  %v1945_v0 = vadd.f32 1.0, %v1944_v21  ;;  %v1894_v50 = vadd.f32 1.1283791, %v1893_v56  ;;  %v1934_v16 = vadd.f32 1.1283791, %v1933_v35 }
 0xe4a   :  { %v1824_v28 = vmul.f32 %v1823_v47, %v3105_v34  ;;  %v1863_v22 = vadd.f32 0.4994258, %v1862_v53  ;;  %v3164_v51 = vmul.f32 0.5, %v3081_v37  ;;  %v1853_v60 = vmul.f32 %v1852_v45, %v3111_v2 }
 0xe4b   :  { %2213 = vrcp.f32 %v1905_v15  ;;  %v1915_v44 = vand.u32 2147483647, %v1905_v15  ;;  %v1917_v10 = vand.u32 2147483648, %v1905_v15  ;;  %v1955_v27 = vand.u32 2147483647, %v1945_v0 }
 0xe4c   :  { %2215 = vrcp.f32 %v1945_v0  ;;  %v3153_v38 = vadd.f32 1.0, %v1824_v28  ;;  %v1864_v36 = vmul.f32 %v1863_v22, %v3111_v2  ;;  %v1814_v32 = vadd.f32 1.1283791, %v1813_v46 }
 0xe4d   :  { %v1957_v24 = vand.u32 2147483648, %v1945_v0  ;;  %v1895_v14 = vmul.f32 %v1894_v50, %v3089_v11  ;;  %v1935_v30 = vmul.f32 %v1934_v16, %v3092_v39  ;;  %vm1911_vm9 = vweird.f32 %v1905_v15 }
 0xe4e   :  { %2217 = vrcp.f32 %v3153_v38  ;;  %v3158_v59 = vadd.f32 1.0, %v1864_v36  ;;  %vm1951_vm1 = vweird.f32 %v1945_v0  ;;  %vm1916_vm10 = vcmp.eq.f32.partialorder %v1915_v44, 8.507059e+37 }
 0xe4f   :  { %v1918_v48 = vor.u32 1.1754944e-38, %v1917_v10  ;;  %vm1956_vm11 = vcmp.eq.f32.partialorder %v1955_v27, 8.507059e+37  ;;  %v1958_v21 = vor.u32 1.1754944e-38, %v1957_v24  ;;  %v1837_v11 = vand.u32 2147483648, %v3153_v38 }
 0xe50   :  { %2219 = vrcp.f32 %v3158_v59  ;;  %v1835_v40 = vand.u32 2147483647, %v3153_v38  ;;  %v1854_v47 = vadd.f32 1.1283791, %v1853_v60  ;;  %vm1831_vm14 = vweird.f32 %v3153_v38 }
 0xe51   :  { %v2214_v23 = vpop.eup %2213  ;;  %v1838_v22 = vor.u32 1.1754944e-38, %v1837_v11  ;;  %v1877_v7 = vand.u32 2147483648, %v3158_v59  ;;  %v1875_v35 = vand.u32 2147483647, %v3158_v59  ;;  %v1815_v36 = vmul.f32 %v1814_v32, %v3086_v19 }
 0xe52   :  { %v2216_v33 = vpop.eup %2215  ;;  %v1907_v12 = vmul.f32 %v2214_v23, %v1905_v15  ;;  %vm1912_vm7 = vweird.f32 %v2214_v23  ;;  %vm1836_vm4 = vcmp.eq.f32.partialorder %v1835_v40, 8.507059e+37  ;;  %vm1871_vm5 = vweird.f32 %v3158_v59 }
 0xe53   :  { %v1947_v41 = vmul.f32 %v2216_v33, %v1945_v0  ;;  %vm1952_vm8 = vweird.f32 %v2216_v33  ;;  %vm1913_vm2 = vmor %vm1911_vm9, %vm1912_vm7  ;;  %v1878_v16 = vor.u32 1.1754944e-38, %v1877_v7  ;;  %vm1876_vm7 = vcmp.eq.f32.partialorder %v1875_v35, 8.507059e+37 }
 0xe54   :  { %v1908_v61 = vsub.f32 1.0, %v1907_v12  ;;  %v2218_v18 = vpop.eup %2217  ;;  %vm1953_vm12 = vmor %vm1951_vm1, %vm1952_vm8  ;;  %vm2040_vm8 = vcmask 253952  }
 0xe55   :  { %v1948_v34 = vsub.f32 1.0, %v1947_v41  ;;  %v1827_v2 = vmul.f32 %v2218_v18, %v3153_v38  ;;  %vm1832_vm13 = vweird.f32 %v2218_v18  ;;  %v1855_v41 = vmul.f32 %v1854_v47, %v3095_v42 }
 0xe56   :  { %v1909_v1 = vmul.f32 %v2214_v23, %v1908_v61  ;;  %v2220_v4 = vpop.eup %2219  ;;  %vm1833_vm15 = vmor %vm1831_vm14, %vm1832_vm13 }
 0xe57   :  { %v1949_v37 = vmul.f32 %v2216_v33, %v1948_v34  ;;  %v1828_v31 = vsub.f32 1.0, %v1827_v2  ;;  %v1867_v15 = vmul.f32 %v2220_v4, %v3158_v59  ;;  %vm1872_vm3 = vweird.f32 %v2220_v4 }
 0xe58   :  { %v1910_v20 = vadd.f32 %v2214_v23, %v1909_v1  ;;  %vm1873_vm6 = vmor %vm1871_vm5, %vm1872_vm3  ;;  %v1795_v59 = vmul.f32 0.5, %v3077_v5 }
 0xe59   :  { %v1950_v13 = vadd.f32 %v2216_v33, %v1949_v37  ;;  %v1829_v58 = vmul.f32 %v2218_v18, %v1828_v31  ;;  %v1868_v49 = vsub.f32 1.0, %v1867_v15 }
 0xe5a   :  { %v1914_v26 = vsel %vm1913_vm2, %v2214_v23, %v1910_v20 }
 0xe5b   :  { %v1919_v39 = vsel %vm1916_vm10, %v1918_v48, %v1914_v26  ;;  %v1954_v17 = vsel %vm1953_vm12, %v2216_v33, %v1950_v13  ;;  %v1830_v28 = vadd.f32 %v2218_v18, %v1829_v58  ;;  %v1869_v56 = vmul.f32 %v2220_v4, %v1868_v49 }
 0xe5c   :  { %v1920_v0 = vmul.f32 %v1919_v39, %v1895_v14  ;;  %v1959_v53 = vsel %vm1956_vm11, %v1958_v21, %v1954_v17 }
 0xe5d   :  { %v1960_v6 = vmul.f32 %v1959_v53, %v1935_v30  ;;  %v1834_v23 = vsel %vm1833_vm15, %v2218_v18, %v1830_v28  ;;  %v1870_v38 = vadd.f32 %v2220_v4, %v1869_v56  ;;  %v1996_v18 = vld [vmem:[#allocation2] sm:$0x1] }
 0xe5e   :  { %v2121_v54 = vclamps-f32 %v1920_v0, 1.0  ;;  %v1839_v46 = vsel %vm1836_vm4, %v1838_v22, %v1834_v23 }
 0xe5f   :  { %v2122_v29 = vclamps-f32 %v1960_v6, 1.0  ;;  %v1840_v50 = vmul.f32 %v1839_v46, %v1815_v36  ;;  %v1874_v61 = vsel %vm1873_vm6, %v2220_v4, %v1870_v38 }
 0xe60   :  { %v1965_v45 = vadd.f32 1.0, %v2121_v54  ;;  %v1879_v10 = vsel %vm1876_vm7, %v1878_v16, %v1874_v61 }
 0xe61   :  { %v1966_v33 = vadd.f32 1.0, %v2122_v29  ;;  %v2119_v44 = vclamps-f32 %v1840_v50, 1.0  ;;  %v1880_v27 = vmul.f32 %v1879_v10, %v1855_v41 }
 0xe62   :  { %v1969_v12 = vmul.f32 %v1965_v45, %v3161_v25 }
 0xe63   :  { %v1970_v60 = vmul.f32 %v1966_v33, %v3164_v51  ;;  %v1963_v25 = vadd.f32 1.0, %v2119_v44  ;;  %v2120_v32 = vclamps-f32 %v1880_v27, 1.0  ;;  %v1796_v51 = vmul.f32 0.5, %v3083_v63 }
 0xe64   :  { %v1973_v19 = vmul.f32 %v1969_v12, %v2552_v8 }
 0xe65   :  { %v1974_v34 = vmul.f32 %v1970_v60, %v2554_v43  ;;  %v1967_v42 = vmul.f32 %v1963_v25, %v1795_v59  ;;  %v1964_v1 = vadd.f32 1.0, %v2120_v32 }
 0xe66   :  { %1983 = vrot.lane.b32.xlu0 %v1973_v19, %s2226_s3 }
 0xe67   :  { %1985 = vrot.lane.b32.xlu2 %v1974_v34, %s2226_s3  ;;  %v1971_v24 = vmul.f32 %v1967_v42, %v2542_v52  ;;  %v1968_v8 = vmul.f32 %v1964_v1, %v1796_v51 }
 0xe69   :  { %1979 = vrot.lane.b32.xlu1 %v1971_v24, %s2226_s3  ;;  %v1972_v43 = vmul.f32 %v1968_v8, %v2540_v57 }
 0xe6e   :  { %1981 = vrot.lane.b32.xlu0 %v1972_v43, %s2226_s3 }
 0xe6f   :  { %1999 = vperm.xlu2 %2142, %v1996_v18  }
 0xec1   :  { %v1986_v5 = vpop.permute.xlu2 %1985 }
 0xec2   :  { %v1994_v14 = vadd.f32 %v1986_v5, %v2778_v9  ;;  %v1995_v9 = vld [vmem:[%s3219_s9] sm:$0x1] }
 0xec4   :  { %2123 = vmatpush.xpose.msk.msrb.mxu0 %vm75_vm0, %v1994_v14 }
 0xec9   :  { %v2000_v2 = vpop.permute.xlu2 %1999 }
 0xed8   :  { %v1984_v30 = vpop.permute.xlu0 %1983 }
 0xed9   :  { %v1993_v63 = vadd.f32 %v1984_v30, %v2773_v3  ;;  %v2002_v3 = vperm.slane %v2000_v2, 0 }
 0xedb   :  { %2124 = vmatpush.xpose.msk.msrb.mxu0 %vm75_vm0, %v1993_v63  ;;  %v1980_v20 = vpop.permute.xlu1 %1979 }
 0xedc   :  { %v1991_v57 = vadd.f32 %v1980_v20, %v2760_v62 }
 0xee0   :  { %v1982_v52 = vpop.permute.xlu0 %1981 }
 0xee1   :  { %v1992_v37 = vadd.f32 %v1982_v52, %v2765_v55  ;;  %v2038_v55 = vld [vmem:[%s3220_s2] sm:$0x1] }
 0xee3   :  { %2125 = vmatpush.xpose.msk.msrb.mxu0 %vm75_vm0, %v1992_v37 }
 0xee7   :  { %2126 = vmatpush.xpose.msk.msrb.mxu0 %vm75_vm0, %v1991_v57 }
 0xeea   :  { %2127 = vmatmul.msk.f32.vlgmr.msrb.gmra.mxu0 %vm75_vm0, %v1995_v9 }
 0xf67   :  { %v2035_v48 = vpop.f32.mrf.mxu0 }
 0xf68   :  { %v2036_v13 = vadd.f32 %v2035_v48, %v2002_v3 }
 0xf6a   :  { %v2039_v4 = vmul.f32 %v2038_v55, %v2036_v13 }
 0xf6c   :  { %2041 = vst.msk [vmem:[%s3221_s11] sm:$0x1] %vm2040_vm8, %v2039_v4 }

</bundles_post_ra>
